<compile_context>
chip_gen: v6e
topology: v6e:2x2x1
jax: 0.10.0
libtpu: 0.0.40
codegen_flags: <defaults>
</compile_context>

<pallas_src>
import jax
import jax.numpy as jnp
from jax.experimental import pallas as pl
from jax.experimental.pallas import tpu as pltpu

TOP_K = 50            # matches top_k_top_p_filtering(top_k=50, top_p=1.0)
NEG_INF = -1e30       # stand-in for torch's float('-inf') filter value
F32_BIG = 3.0e38      # finite +/- sentinel for running min/max tracking
BSEARCH_ITERS = 20    # value-space bisection steps for the k-th largest logit
LANE = 128            # TPU lane width
MXU_N = 256           # v6e/v7x MXU N width (also a multiple of v5e's 128)
MAX_TV = 2048         # vocab tile cap (review: 512-2048 lanes)


def _make_kernel(*, v_real, tv, tb, n_tiles, unroll):
    start_v = max(n_tiles - 2, 0)      # when to start the Gumbel-noise DMA
    last_v = n_tiles - 1

    def kernel(h_ref, w1_ref, b1_ref, w2_ref, b2_ref, g_hbm,
               tok_ref, probs_ref,
               h1_ref, mn_ref, mx_ref, gbuf_ref, gsem):
        b = pl.program_id(0)
        v = pl.program_id(1)
        vp = probs_ref.shape[-1]       # padded vocab (static)

        def gumbel_copy():
            row0 = pl.multiple_of(b * tb, tb)
            return pltpu.make_async_copy(g_hbm.at[pl.ds(row0, tb)],
                                         gbuf_ref, gsem)

        # ---- hidden layer + running-stat init, once per batch block --------
        @pl.when(v == 0)
        def _():
            h = h_ref[...].astype(jnp.bfloat16)                        # (tb, H)
            pre = (jnp.dot(h, w1_ref[...],
                           preferred_element_type=jnp.float32)
                   + b1_ref[...])                                      # f32
            h1_ref[...] = jnp.tanh(pre).astype(jnp.bfloat16)
            mn_ref[...] = jnp.full(mn_ref.shape, F32_BIG, jnp.float32)
            mx_ref[...] = jnp.full(mx_ref.shape, -F32_BIG, jnp.float32)

        # ---- prefetch the Gumbel noise used only in the epilogue; single
        #      VMEM landing buffer, DMA overlapped with the last w2 tile -----
        @pl.when(v == start_v)
        def _():
            gumbel_copy().start()

        # ---- logits for this vocab slab, staged into the resident block ----
        off = pl.multiple_of(v * tv, tv)
        logits_tile = (jnp.dot(h1_ref[...], w2_ref[...],
                               preferred_element_type=jnp.float32)
                       + b2_ref[:, pl.ds(off, tv)])                    # (tb, tv)
        probs_ref[:, pl.ds(off, tv)] = logits_tile

        # running min/max of the *real* (non-pad) logits -> tight bisection
        # bracket in the epilogue (pads sit at NEG_INF via the b2 padding).
        col = off + jax.lax.broadcasted_iota(jnp.int32, logits_tile.shape, 1)
        real = col < v_real
        mn_ref[...] = jnp.minimum(
            mn_ref[...],
            jnp.min(jnp.where(real, logits_tile, F32_BIG), axis=-1,
                    keepdims=True))
        mx_ref[...] = jnp.maximum(
            mx_ref[...],
            jnp.max(jnp.where(real, logits_tile, -F32_BIG), axis=-1,
                    keepdims=True))

        # ---- last tile: top-k filter, softmax, Gumbel-max sample -----------
        @pl.when(v == last_v)
        def _():
            logits = probs_ref[...]                                    # (tb, Vp)

            # top_k_top_p_filtering(top_k=50, top_p=1.0): value-space
            # bisection for the k-th largest logit; bracket seeded from the
            # streamed per-row min/max (keeps resolution with few iterations).
            lo = mn_ref[...]                               # count(>= lo) >= K
            hi = mx_ref[...]
            hi = hi + jnp.maximum(jnp.abs(hi) * 1e-6, 1e-6)  # count(>= hi) == 0

            def body(_, carry):
                lo_c, hi_c = carry
                mid = 0.5 * (lo_c + hi_c)
                cnt = jnp.sum((logits >= mid).astype(jnp.float32),
                              axis=-1, keepdims=True)
                ge = cnt >= TOP_K
                return jnp.where(ge, mid, lo_c), jnp.where(ge, hi_c, mid)

            lo, hi = jax.lax.fori_loop(0, BSEARCH_ITERS, body, (lo, hi),
                                       unroll=unroll)
            kth_val = lo                                   # k-th largest logit
            filt = jnp.where(logits >= kth_val, logits, NEG_INF)

            # softmax; divide moved to the EUP via approx reciprocal plus one
            # Newton step (full f32 accuracy, no VALU divide).
            m = jnp.max(filt, axis=-1, keepdims=True)
            e = jnp.exp(filt - m)
            s = jnp.sum(e, axis=-1, keepdims=True)
            inv = pl.reciprocal(s, approx=True)
            inv = inv * (2.0 - s * inv)
            probs_ref[...] = e * inv

            # torch.multinomial(probs, 1) via Gumbel-max; noise DMA started
            # one grid step earlier.
            gumbel_copy().wait()
            scores = filt + gbuf_ref[...]                  # filtered stay ~-1e30
            ids = jax.lax.broadcasted_iota(jnp.int32, scores.shape, 1)
            best = jnp.max(scores, axis=-1, keepdims=True)
            tok = jnp.min(jnp.where(scores >= best, ids, vp),
                          axis=-1, keepdims=True)          # (tb, 1)
            tok_ref[...] = jnp.broadcast_to(tok, tok_ref.shape).astype(jnp.int32)

    return kernel


def guided_qa_sample(h_last, w1, b1, w2, b2, gumbel):
    """top_k(50)/top_p(1.0) filter + softmax + multinomial(1) over LM-head logits."""
    B, H = h_last.shape
    V = w2.shape[1]

    # ---- per-generation VMEM budget (v5e/v6e: 128 MiB, v7x: 64 MiB) --------
    try:
        vmem_phys = int(pltpu.get_tpu_info().vmem_capacity_bytes)
    except Exception:
        vmem_phys = 64 << 20                      # conservative (v7x) fallback
    vmem_limit = int(min((vmem_phys * 3) // 4, 96 << 20))

    # batch tile: full batch (small B) or 8-sublane multiples for large B
    TB = B if B <= 8 else (8 if B % 8 == 0 else B)
    n_b = B // TB

    # vocab tile: largest MXU-width multiple that fits after the resident
    # blocks, capped at MAX_TV lanes
    V_round = ((V + MXU_N - 1) // MXU_N) * MXU_N
    fixed_bytes = (TB * V_round * 4               # resident probs block
                   + TB * V_round * 4             # gumbel VMEM scratch
                   + 8 * V_round * 4              # resident b2 (sublane-padded)
                   + 2 * H * H * 2                # w1 (bf16)
                   + 2 * 8 * H * 4                # b1
                   + TB * H * (2 * 4 + 2)         # h block + h1 scratch
                   + 4 * TB * LANE * 4)           # token slab + slack
    avail = max(vmem_limit - fixed_bytes, 0)
    tv_budget = (avail // (2 * H * 2)) // MXU_N * MXU_N   # 2 bufs x H x bf16
    TV = int(max(MXU_N, min(tv_budget, MAX_TV, V_round)))
    Vp = ((V + TV - 1) // TV) * TV
    n_tiles = Vp // TV

    # pad the vocab axis so w2 always stays a streamed tile (never a resident
    # (H, V) block); pad logits land at NEG_INF via b2 and get filtered.
    if Vp != V:
        w2 = jnp.pad(w2, ((0, 0), (0, Vp - V)))
        b2 = jnp.pad(b2, ((0, 0), (0, Vp - V)), constant_values=NEG_INF)
        gumbel = jnp.pad(gumbel, ((0, 0), (0, Vp - V)))

    # deeper w2 pipelining only when there are enough tiles and spare VMEM
    w2_kwargs = {}
    if n_tiles >= 4 and avail > 4 * H * TV * 2:
        w2_kwargs["pipeline_mode"] = pl.Buffered(3)

    kernel = _make_kernel(v_real=V, tv=TV, tb=TB, n_tiles=n_tiles,
                          unroll=True if Vp <= 2048 else 4)

    tok_pad, probs = pl.pallas_call(
        kernel,
        grid=(n_b, n_tiles),
        in_specs=[
            pl.BlockSpec((TB, H), lambda b, v: (b, 0)),               # hidden
            pl.BlockSpec((H, H), lambda b, v: (0, 0)),                # w1 (bf16)
            pl.BlockSpec((1, H), lambda b, v: (0, 0)),                # b1
            pl.BlockSpec((H, TV), lambda b, v: (0, v), **w2_kwargs),  # w2 tile
            pl.BlockSpec((1, Vp), lambda b, v: (0, 0)),               # b2, resident
            pl.BlockSpec(memory_space=pl.ANY),                        # gumbel (manual DMA)
        ],
        out_specs=(
            pl.BlockSpec((TB, LANE), lambda b, v: (b, 0)),   # token slab (lane-dense)
            pl.BlockSpec((TB, Vp), lambda b, v: (b, 0)),     # probs (resident)
        ),
        out_shape=(jax.ShapeDtypeStruct((B, LANE), jnp.int32),
                   jax.ShapeDtypeStruct((B, Vp), jnp.float32)),
        scratch_shapes=[
            pltpu.VMEM((TB, H), jnp.bfloat16),     # h1, reused across vocab tiles
            pltpu.VMEM((TB, 1), jnp.float32),      # running min of real logits
            pltpu.VMEM((TB, 1), jnp.float32),      # running max of real logits
            pltpu.VMEM((TB, Vp), jnp.float32),     # Gumbel-noise landing buffer
            pltpu.SemaphoreType.DMA(()),           # Gumbel DMA completion
        ],
        compiler_params=pltpu.CompilerParams(
            dimension_semantics=("parallel", "arbitrary"),
            vmem_limit_bytes=vmem_limit),
    )(h_last, w1, b1, w2, b2, gumbel)
    return tok_pad[:, :1], probs[:, :V]


if __name__ == "__main__":
    V, H, S, B = 256, 128, 8, 1   # vocab, hidden (lane-aligned), seq, batch

    key = jax.random.PRNGKey(0)
    k_emb, k_pos, k_w1, k_b1, k_w2, k_b2, k_g = jax.random.split(key, 7)
    embed = jax.random.normal(k_emb, (V, H), jnp.float32) * 0.02
    pos = jax.random.normal(k_pos, (S, H), jnp.float32) * 0.02
    w1 = (jax.random.normal(k_w1, (H, H), jnp.float32)
          * (1.0 / jnp.sqrt(H))).astype(jnp.bfloat16)
    b1 = jax.random.normal(k_b1, (1, H), jnp.float32) * 0.01
    w2 = (jax.random.normal(k_w2, (H, V), jnp.float32)
          * (1.0 / jnp.sqrt(H))).astype(jnp.bfloat16)
    b2 = jax.random.normal(k_b2, (1, V), jnp.float32) * 0.01

    # TODO(synk): HF AutoTokenizer.encode replaced by a synthetic byte tokenizer.
    question = "What color is the sky?"
    context = "The sky is blue. "
    text = (context + question)[-S:]
    input_ids = jnp.array([[ord(c) % V for c in text]], dtype=jnp.int32)  # (B, S)

    # glue: embedding lookup + positional embedding, last-position hidden state
    h = embed[input_ids] + pos[None, :, :]          # (B, S, H)
    h_last = h[:, -1, :]                            # (B, H)

    # torch.multinomial's RNG draw, realised as host-side standard-Gumbel noise.
    gumbel = jax.random.gumbel(k_g, (B, V), jnp.float32)

    tok, probs = guided_qa_sample(h_last, w1, b1, w2, b2, gumbel)
    tok = jax.block_until_ready(tok)
    probs = jax.block_until_ready(probs)

    # sanity checks: filtered softmax sums to 1, support size ~= top_k,
    # sampled token lies inside the kept support.
    assert abs(float(probs.sum()) - 1.0) < 1e-3
    support = int((probs[0] > 0.0).sum())
    assert TOP_K <= support <= TOP_K + 2, support
    t = int(tok[0, 0])
    assert 0 <= t < V and float(probs[0, t]) > 0.0

    # TODO(synk): HF tokenizer.decode replaced by a synthetic vocab mapping.
    resulting_string = f"<tok_{t}>"
    _ = resulting_string

    print("KERNEL_OK")
</pallas_src>

<mosaic_0001>
module attributes {stable_mosaic.version = 11 : i64} {
  func.func @kernel(%arg0: i32, %arg1: i32, %arg2: memref<1x128xf32, #tpu.memory_space<vmem>>, %arg3: memref<128x128xbf16, #tpu.memory_space<vmem>>, %arg4: memref<1x128xf32, #tpu.memory_space<vmem>>, %arg5: memref<128x256xbf16, #tpu.memory_space<vmem>>, %arg6: memref<1x256xf32, #tpu.memory_space<vmem>>, %arg7: memref<1x256xf32, #tpu.memory_space<any>>, %arg8: memref<1x128xi32, #tpu.memory_space<vmem>>, %arg9: memref<1x256xf32, #tpu.memory_space<vmem>>, %arg10: memref<1x128xbf16, #tpu.memory_space<vmem>>, %arg11: memref<1x1xf32, #tpu.memory_space<vmem>>, %arg12: memref<1x1xf32, #tpu.memory_space<vmem>>, %arg13: memref<1x256xf32, #tpu.memory_space<vmem>>, %arg14: memref<!tpu.dma_semaphore, #tpu.memory_space<semaphore_mem>>) attributes {dimension_semantics = [#tpu.dimension_semantics<parallel>, #tpu.dimension_semantics<arbitrary>], iteration_bounds = array<i64: 1, 1>, scalar_prefetch = 0 : i64, scratch_operands = 5 : i64, tpu.core_type = #tpu.core_type<tc>, window_params = [{transform_indices = @transform_0, window_bounds = array<i64: 1, 128>}, {pipeline_mode = #tpu.pipeline_mode<synchronous>, transform_indices = @transform_1, window_bounds = array<i64: 128, 128>}, {pipeline_mode = #tpu.pipeline_mode<synchronous>, transform_indices = @transform_2, window_bounds = array<i64: 1, 128>}, {transform_indices = @transform_3, window_bounds = array<i64: 128, 256>}, {pipeline_mode = #tpu.pipeline_mode<synchronous>, transform_indices = @transform_4, window_bounds = array<i64: 1, 256>}, {}, {transform_indices = @transform_6, window_bounds = array<i64: 1, 128>}, {transform_indices = @transform_7, window_bounds = array<i64: 1, 256>}]} {
    %c0_i32 = arith.constant 0 : i32
    %0 = arith.cmpi eq, %arg1, %c0_i32 : i32
    %1 = arith.extui %0 : i1 to i32
    %c0_i32_0 = arith.constant 0 : i32
    %2 = arith.cmpi ne, %1, %c0_i32_0 : i32
    scf.if %2 {
      %c0_23 = arith.constant 0 : index
      %c0_24 = arith.constant 0 : index
      %38 = vector.load %arg2[%c0_23, %c0_24] : memref<1x128xf32, #tpu.memory_space<vmem>>, vector<1x128xf32>
      %39 = arith.truncf %38 : vector<1x128xf32> to vector<1x128xbf16>
      %c0_25 = arith.constant 0 : index
      %c0_26 = arith.constant 0 : index
      %40 = vector.load %arg3[%c0_25, %c0_26] : memref<128x128xbf16, #tpu.memory_space<vmem>>, vector<128x128xbf16>
      %cst_27 = arith.constant dense<0.000000e+00> : vector<1x128xf32>
      %41 = tpu.matmul %39, %40, %cst_27 {dimension_numbers = #tpu.dot_dimension_numbers<[1], [0], [0], [1], [0, 0, 1, 1], [], []>} : vector<1x128xbf16>, vector<128x128xbf16>, vector<1x128xf32> -> vector<1x128xf32>
      %c0_28 = arith.constant 0 : index
      %c0_29 = arith.constant 0 : index
      %42 = vector.load %arg4[%c0_28, %c0_29] : memref<1x128xf32, #tpu.memory_space<vmem>>, vector<1x128xf32>
      %43 = arith.addf %41, %42 : vector<1x128xf32>
      %44 = math.tanh %43 : vector<1x128xf32>
      %45 = arith.truncf %44 : vector<1x128xf32> to vector<1x128xbf16>
      %c0_30 = arith.constant 0 : index
      %c0_31 = arith.constant 0 : index
      %46 = vector.load %arg10[%c0_30, %c0_31] : memref<1x128xbf16, #tpu.memory_space<vmem>>, vector<1x128xbf16>
      tpu.vector_store %arg10[%c0_30, %c0_31], %45 {strides = array<i32>} : memref<1x128xbf16, #tpu.memory_space<vmem>>, vector<1x128xbf16>,
      %cst_32 = arith.constant 3.000000e+38 : f32
      %47 = vector.broadcast %cst_32 : f32 to vector<1x1xf32>
      %c0_33 = arith.constant 0 : index
      %c0_34 = arith.constant 0 : index
      %48 = vector.load %arg11[%c0_33, %c0_34] : memref<1x1xf32, #tpu.memory_space<vmem>>, vector<1x1xf32>
      tpu.vector_store %arg11[%c0_33, %c0_34], %47 {strides = array<i32>} : memref<1x1xf32, #tpu.memory_space<vmem>>, vector<1x1xf32>,
      %cst_35 = arith.constant -3.000000e+38 : f32
      %49 = vector.broadcast %cst_35 : f32 to vector<1x1xf32>
      %c0_36 = arith.constant 0 : index
      %c0_37 = arith.constant 0 : index
      %50 = vector.load %arg12[%c0_36, %c0_37] : memref<1x1xf32, #tpu.memory_space<vmem>>, vector<1x1xf32>
      tpu.vector_store %arg12[%c0_36, %c0_37], %49 {strides = array<i32>} : memref<1x1xf32, #tpu.memory_space<vmem>>, vector<1x1xf32>,
    } else {
    }
    %c0_i32_1 = arith.constant 0 : i32
    %3 = arith.cmpi eq, %arg1, %c0_i32_1 : i32
    %4 = arith.extui %3 : i1 to i32
    %c0_i32_2 = arith.constant 0 : i32
    %5 = arith.cmpi ne, %4, %c0_i32_2 : i32
    scf.if %5 {
      %c1_i32 = arith.constant 1 : i32
      %38 = arith.muli %arg0, %c1_i32 : i32
      %39 = tpu.assume_multiple %38, 1 : i32
      %c0_i32_23 = arith.constant 0 : i32
      %40 = tpu.memref_slice %arg7[%39, %c0_i32_23] : memref<1x256xf32, #tpu.memory_space<any>> -> memref<1x256xf32, #tpu.memory_space<any>>
      tpu.enqueue_dma source(%40 : memref<1x256xf32, #tpu.memory_space<any>>) target(%arg13 : memref<1x256xf32, #tpu.memory_space<vmem>>) target_semaphore(%arg14 : memref<!tpu.dma_semaphore, #tpu.memory_space<semaphore_mem>>)
    } else {
    }
    %c256_i32 = arith.constant 256 : i32
    %6 = arith.muli %arg1, %c256_i32 : i32
    %7 = tpu.assume_multiple %6, 256 : i32
    %c0 = arith.constant 0 : index
    %c0_3 = arith.constant 0 : index
    %8 = vector.load %arg10[%c0, %c0_3] : memref<1x128xbf16, #tpu.memory_space<vmem>>, vector<1x128xbf16>
    %c0_4 = arith.constant 0 : index
    %c0_5 = arith.constant 0 : index
    %9 = vector.load %arg5[%c0_4, %c0_5] : memref<128x256xbf16, #tpu.memory_space<vmem>>, vector<128x256xbf16>
    %cst = arith.constant dense<0.000000e+00> : vector<1x256xf32>
    %10 = tpu.matmul %8, %9, %cst {dimension_numbers = #tpu.dot_dimension_numbers<[1], [0], [0], [1], [0, 0, 1, 1], [], []>} : vector<1x128xbf16>, vector<128x256xbf16>, vector<1x256xf32> -> vector<1x256xf32>
    %c0_6 = arith.constant 0 : index
    %11 = arith.index_cast %7 : i32 to index
    %12 = vector.load %arg6[%c0_6, %11] : memref<1x256xf32, #tpu.memory_space<vmem>>, vector<1x256xf32>
    %13 = arith.addf %10, %12 : vector<1x256xf32>
    %c0_7 = arith.constant 0 : index
    %14 = arith.index_cast %7 : i32 to index
    %15 = vector.load %arg9[%c0_7, %14] : memref<1x256xf32, #tpu.memory_space<vmem>>, vector<1x256xf32>
    tpu.vector_store %arg9[%c0_7, %14], %13 {strides = array<i32>} : memref<1x256xf32, #tpu.memory_space<vmem>>, vector<1x256xf32>,
    %16 = tpu.iota {dimensions = array<i32: 1>} : vector<1x256xi32>
    %17 = vector.broadcast %7 : i32 to vector<1x256xi32>
    %18 = arith.addi %17, %16 : vector<1x256xi32>
    %c256_i32_8 = arith.constant 256 : i32
    %19 = vector.broadcast %c256_i32_8 : i32 to vector<1x256xi32>
    %20 = arith.cmpi slt, %18, %19 : vector<1x256xi32>
    %c0_9 = arith.constant 0 : index
    %c0_10 = arith.constant 0 : index
    %21 = vector.load %arg11[%c0_9, %c0_10] : memref<1x1xf32, #tpu.memory_space<vmem>>, vector<1x1xf32>
    %cst_11 = arith.constant 3.000000e+38 : f32
    %22 = vector.broadcast %cst_11 : f32 to vector<1x256xf32>
    %23 = arith.select %20, %13, %22 : vector<1x256xi1>, vector<1x256xf32>
    %cst_12 = arith.constant dense<0x7F800000> : vector<1xf32>
    %24 = vector.multi_reduction <minimumf>, %23, %cst_12 [1] : vector<1x256xf32> to vector<1xf32>
    %25 = vector.shape_cast %24 : vector<1xf32> to vector<1x1xf32>
    %26 = arith.minimumf %21, %25 : vector<1x1xf32>
    %c0_13 = arith.constant 0 : index
    %c0_14 = arith.constant 0 : index
    %27 = vector.load %arg11[%c0_13, %c0_14] : memref<1x1xf32, #tpu.memory_space<vmem>>, vector<1x1xf32>
    tpu.vector_store %arg11[%c0_13, %c0_14], %26 {strides = array<i32>} : memref<1x1xf32, #tpu.memory_space<vmem>>, vector<1x1xf32>,
    %c0_15 = arith.constant 0 : index
    %c0_16 = arith.constant 0 : index
    %28 = vector.load %arg12[%c0_15, %c0_16] : memref<1x1xf32, #tpu.memory_space<vmem>>, vector<1x1xf32>
    %cst_17 = arith.constant -3.000000e+38 : f32
    %29 = vector.broadcast %cst_17 : f32 to vector<1x256xf32>
    %30 = arith.select %20, %13, %29 : vector<1x256xi1>, vector<1x256xf32>
    %cst_18 = arith.constant dense<0xFF800000> : vector<1xf32>
    %31 = vector.multi_reduction <maximumf>, %30, %cst_18 [1] : vector<1x256xf32> to vector<1xf32>
    %32 = vector.shape_cast %31 : vector<1xf32> to vector<1x1xf32>
    %33 = arith.maximumf %28, %32 : vector<1x1xf32>
    %c0_19 = arith.constant 0 : index
    %c0_20 = arith.constant 0 : index
    %34 = vector.load %arg12[%c0_19, %c0_20] : memref<1x1xf32, #tpu.memory_space<vmem>>, vector<1x1xf32>
    tpu.vector_store %arg12[%c0_19, %c0_20], %33 {strides = array<i32>} : memref<1x1xf32, #tpu.memory_space<vmem>>, vector<1x1xf32>,
    %c0_i32_21 = arith.constant 0 : i32
    %35 = arith.cmpi eq, %arg1, %c0_i32_21 : i32
    %36 = arith.extui %35 : i1 to i32
    %c0_i32_22 = arith.constant 0 : i32
    %37 = arith.cmpi ne, %36, %c0_i32_22 : i32
    scf.if %37 {
      %c0_23 = arith.constant 0 : index
      %c0_24 = arith.constant 0 : index
      %38 = vector.load %arg9[%c0_23, %c0_24] : memref<1x256xf32, #tpu.memory_space<vmem>>, vector<1x256xf32>
      %c0_25 = arith.constant 0 : index
      %c0_26 = arith.constant 0 : index
      %39 = vector.load %arg11[%c0_25, %c0_26] : memref<1x1xf32, #tpu.memory_space<vmem>>, vector<1x1xf32>
      %c0_27 = arith.constant 0 : index
      %c0_28 = arith.constant 0 : index
      %40 = vector.load %arg12[%c0_27, %c0_28] : memref<1x1xf32, #tpu.memory_space<vmem>>, vector<1x1xf32>
      %41 = math.absf %40 : vector<1x1xf32>
      %cst_29 = arith.constant 9.99999997E-7 : f32
      %42 = vector.broadcast %cst_29 : f32 to vector<1x1xf32>
      %43 = arith.mulf %41, %42 : vector<1x1xf32>
      %cst_30 = arith.constant 9.99999997E-7 : f32
      %44 = vector.broadcast %cst_30 : f32 to vector<1x1xf32>
      %45 = arith.maximumf %43, %44 : vector<1x1xf32>
      %46 = arith.addf %40, %45 : vector<1x1xf32>
      %c0_i32_31 = arith.constant 0 : i32
      %47 = arith.addf %39, %46 : vector<1x1xf32>
      %cst_32 = arith.constant 5.000000e-01 : f32
      %48 = vector.broadcast %cst_32 : f32 to vector<1x1xf32>
      %49 = arith.mulf %48, %47 : vector<1x1xf32>
      %50 = vector.broadcast %49 : vector<1x1xf32> to vector<1x256xf32>
      %51 = arith.cmpf oge, %38, %50 : vector<1x256xf32>
      %52 = arith.extui %51 : vector<1x256xi1> to vector<1x256xi32>
      %53 = arith.sitofp %52 : vector<1x256xi32> to vector<1x256xf32>
      %cst_33 = arith.constant dense<0.000000e+00> : vector<1xf32>
      %54 = vector.multi_reduction <add>, %53, %cst_33 [1] : vector<1x256xf32> to vector<1xf32>
      %55 = vector.shape_cast %54 : vector<1xf32> to vector<1x1xf32>
      %cst_34 = arith.constant 5.000000e+01 : f32
      %56 = vector.broadcast %cst_34 : f32 to vector<1x1xf32>
      %57 = arith.cmpf oge, %55, %56 : vector<1x1xf32>
      %58 = arith.select %57, %49, %39 : vector<1x1xi1>, vector<1x1xf32>
      %59 = arith.select %57, %46, %49 : vector<1x1xi1>, vector<1x1xf32>
      %c1_i32 = arith.constant 1 : i32
      %60 = arith.addf %58, %59 : vector<1x1xf32>
      %cst_35 = arith.constant 5.000000e-01 : f32
      %61 = vector.broadcast %cst_35 : f32 to vector<1x1xf32>
      %62 = arith.mulf %61, %60 : vector<1x1xf32>
      %63 = vector.broadcast %62 : vector<1x1xf32> to vector<1x256xf32>
      %64 = arith.cmpf oge, %38, %63 : vector<1x256xf32>
      %65 = arith.extui %64 : vector<1x256xi1> to vector<1x256xi32>
      %66 = arith.sitofp %65 : vector<1x256xi32> to vector<1x256xf32>
      %cst_36 = arith.constant dense<0.000000e+00> : vector<1xf32>
      %67 = vector.multi_reduction <add>, %66, %cst_36 [1] : vector<1x256xf32> to vector<1xf32>
      %68 = vector.shape_cast %67 : vector<1xf32> to vector<1x1xf32>
      %cst_37 = arith.constant 5.000000e+01 : f32
      %69 = vector.broadcast %cst_37 : f32 to vector<1x1xf32>
      %70 = arith.cmpf oge, %68, %69 : vector<1x1xf32>
      %71 = arith.select %70, %62, %58 : vector<1x1xi1>, vector<1x1xf32>
      %72 = arith.select %70, %59, %62 : vector<1x1xi1>, vector<1x1xf32>
      %c2_i32 = arith.constant 2 : i32
      %73 = arith.addf %71, %72 : vector<1x1xf32>
      %cst_38 = arith.constant 5.000000e-01 : f32
      %74 = vector.broadcast %cst_38 : f32 to vector<1x1xf32>
      %75 = arith.mulf %74, %73 : vector<1x1xf32>
      %76 = vector.broadcast %75 : vector<1x1xf32> to vector<1x256xf32>
      %77 = arith.cmpf oge, %38, %76 : vector<1x256xf32>
      %78 = arith.extui %77 : vector<1x256xi1> to vector<1x256xi32>
      %79 = arith.sitofp %78 : vector<1x256xi32> to vector<1x256xf32>
      %cst_39 = arith.constant dense<0.000000e+00> : vector<1xf32>
      %80 = vector.multi_reduction <add>, %79, %cst_39 [1] : vector<1x256xf32> to vector<1xf32>
      %81 = vector.shape_cast %80 : vector<1xf32> to vector<1x1xf32>
      %cst_40 = arith.constant 5.000000e+01 : f32
      %82 = vector.broadcast %cst_40 : f32 to vector<1x1xf32>
      %83 = arith.cmpf oge, %81, %82 : vector<1x1xf32>
      %84 = arith.select %83, %75, %71 : vector<1x1xi1>, vector<1x1xf32>
      %85 = arith.select %83, %72, %75 : vector<1x1xi1>, vector<1x1xf32>
      %c3_i32 = arith.constant 3 : i32
      %86 = arith.addf %84, %85 : vector<1x1xf32>
      %cst_41 = arith.constant 5.000000e-01 : f32
      %87 = vector.broadcast %cst_41 : f32 to vector<1x1xf32>
      %88 = arith.mulf %87, %86 : vector<1x1xf32>
      %89 = vector.broadcast %88 : vector<1x1xf32> to vector<1x256xf32>
      %90 = arith.cmpf oge, %38, %89 : vector<1x256xf32>
      %91 = arith.extui %90 : vector<1x256xi1> to vector<1x256xi32>
      %92 = arith.sitofp %91 : vector<1x256xi32> to vector<1x256xf32>
      %cst_42 = arith.constant dense<0.000000e+00> : vector<1xf32>
      %93 = vector.multi_reduction <add>, %92, %cst_42 [1] : vector<1x256xf32> to vector<1xf32>
      %94 = vector.shape_cast %93 : vector<1xf32> to vector<1x1xf32>
      %cst_43 = arith.constant 5.000000e+01 : f32
      %95 = vector.broadcast %cst_43 : f32 to vector<1x1xf32>
      %96 = arith.cmpf oge, %94, %95 : vector<1x1xf32>
      %97 = arith.select %96, %88, %84 : vector<1x1xi1>, vector<1x1xf32>
      %98 = arith.select %96, %85, %88 : vector<1x1xi1>, vector<1x1xf32>
      %c4_i32 = arith.constant 4 : i32
      %99 = arith.addf %97, %98 : vector<1x1xf32>
      %cst_44 = arith.constant 5.000000e-01 : f32
      %100 = vector.broadcast %cst_44 : f32 to vector<1x1xf32>
      %101 = arith.mulf %100, %99 : vector<1x1xf32>
      %102 = vector.broadcast %101 : vector<1x1xf32> to vector<1x256xf32>
      %103 = arith.cmpf oge, %38, %102 : vector<1x256xf32>
      %104 = arith.extui %103 : vector<1x256xi1> to vector<1x256xi32>
      %105 = arith.sitofp %104 : vector<1x256xi32> to vector<1x256xf32>
      %cst_45 = arith.constant dense<0.000000e+00> : vector<1xf32>
      %106 = vector.multi_reduction <add>, %105, %cst_45 [1] : vector<1x256xf32> to vector<1xf32>
      %107 = vector.shape_cast %106 : vector<1xf32> to vector<1x1xf32>
      %cst_46 = arith.constant 5.000000e+01 : f32
      %108 = vector.broadcast %cst_46 : f32 to vector<1x1xf32>
      %109 = arith.cmpf oge, %107, %108 : vector<1x1xf32>
      %110 = arith.select %109, %101, %97 : vector<1x1xi1>, vector<1x1xf32>
      %111 = arith.select %109, %98, %101 : vector<1x1xi1>, vector<1x1xf32>
      %c5_i32 = arith.constant 5 : i32
      %112 = arith.addf %110, %111 : vector<1x1xf32>
      %cst_47 = arith.constant 5.000000e-01 : f32
      %113 = vector.broadcast %cst_47 : f32 to vector<1x1xf32>
      %114 = arith.mulf %113, %112 : vector<1x1xf32>
      %115 = vector.broadcast %114 : vector<1x1xf32> to vector<1x256xf32>
      %116 = arith.cmpf oge, %38, %115 : vector<1x256xf32>
      %117 = arith.extui %116 : vector<1x256xi1> to vector<1x256xi32>
      %118 = arith.sitofp %117 : vector<1x256xi32> to vector<1x256xf32>
      %cst_48 = arith.constant dense<0.000000e+00> : vector<1xf32>
      %119 = vector.multi_reduction <add>, %118, %cst_48 [1] : vector<1x256xf32> to vector<1xf32>
      %120 = vector.shape_cast %119 : vector<1xf32> to vector<1x1xf32>
      %cst_49 = arith.constant 5.000000e+01 : f32
      %121 = vector.broadcast %cst_49 : f32 to vector<1x1xf32>
      %122 = arith.cmpf oge, %120, %121 : vector<1x1xf32>
      %123 = arith.select %122, %114, %110 : vector<1x1xi1>, vector<1x1xf32>
      %124 = arith.select %122, %111, %114 : vector<1x1xi1>, vector<1x1xf32>
      %c6_i32 = arith.constant 6 : i32
      %125 = arith.addf %123, %124 : vector<1x1xf32>
      %cst_50 = arith.constant 5.000000e-01 : f32
      %126 = vector.broadcast %cst_50 : f32 to vector<1x1xf32>
      %127 = arith.mulf %126, %125 : vector<1x1xf32>
      %128 = vector.broadcast %127 : vector<1x1xf32> to vector<1x256xf32>
      %129 = arith.cmpf oge, %38, %128 : vector<1x256xf32>
      %130 = arith.extui %129 : vector<1x256xi1> to vector<1x256xi32>
      %131 = arith.sitofp %130 : vector<1x256xi32> to vector<1x256xf32>
      %cst_51 = arith.constant dense<0.000000e+00> : vector<1xf32>
      %132 = vector.multi_reduction <add>, %131, %cst_51 [1] : vector<1x256xf32> to vector<1xf32>
      %133 = vector.shape_cast %132 : vector<1xf32> to vector<1x1xf32>
      %cst_52 = arith.constant 5.000000e+01 : f32
      %134 = vector.broadcast %cst_52 : f32 to vector<1x1xf32>
      %135 = arith.cmpf oge, %133, %134 : vector<1x1xf32>
      %136 = arith.select %135, %127, %123 : vector<1x1xi1>, vector<1x1xf32>
      %137 = arith.select %135, %124, %127 : vector<1x1xi1>, vector<1x1xf32>
      %c7_i32 = arith.constant 7 : i32
      %138 = arith.addf %136, %137 : vector<1x1xf32>
      %cst_53 = arith.constant 5.000000e-01 : f32
      %139 = vector.broadcast %cst_53 : f32 to vector<1x1xf32>
      %140 = arith.mulf %139, %138 : vector<1x1xf32>
      %141 = vector.broadcast %140 : vector<1x1xf32> to vector<1x256xf32>
      %142 = arith.cmpf oge, %38, %141 : vector<1x256xf32>
      %143 = arith.extui %142 : vector<1x256xi1> to vector<1x256xi32>
      %144 = arith.sitofp %143 : vector<1x256xi32> to vector<1x256xf32>
      %cst_54 = arith.constant dense<0.000000e+00> : vector<1xf32>
      %145 = vector.multi_reduction <add>, %144, %cst_54 [1] : vector<1x256xf32> to vector<1xf32>
      %146 = vector.shape_cast %145 : vector<1xf32> to vector<1x1xf32>
      %cst_55 = arith.constant 5.000000e+01 : f32
      %147 = vector.broadcast %cst_55 : f32 to vector<1x1xf32>
      %148 = arith.cmpf oge, %146, %147 : vector<1x1xf32>
      %149 = arith.select %148, %140, %136 : vector<1x1xi1>, vector<1x1xf32>
      %150 = arith.select %148, %137, %140 : vector<1x1xi1>, vector<1x1xf32>
      %c8_i32 = arith.constant 8 : i32
      %151 = arith.addf %149, %150 : vector<1x1xf32>
      %cst_56 = arith.constant 5.000000e-01 : f32
      %152 = vector.broadcast %cst_56 : f32 to vector<1x1xf32>
      %153 = arith.mulf %152, %151 : vector<1x1xf32>
      %154 = vector.broadcast %153 : vector<1x1xf32> to vector<1x256xf32>
      %155 = arith.cmpf oge, %38, %154 : vector<1x256xf32>
      %156 = arith.extui %155 : vector<1x256xi1> to vector<1x256xi32>
      %157 = arith.sitofp %156 : vector<1x256xi32> to vector<1x256xf32>
      %cst_57 = arith.constant dense<0.000000e+00> : vector<1xf32>
      %158 = vector.multi_reduction <add>, %157, %cst_57 [1] : vector<1x256xf32> to vector<1xf32>
      %159 = vector.shape_cast %158 : vector<1xf32> to vector<1x1xf32>
      %cst_58 = arith.constant 5.000000e+01 : f32
      %160 = vector.broadcast %cst_58 : f32 to vector<1x1xf32>
      %161 = arith.cmpf oge, %159, %160 : vector<1x1xf32>
      %162 = arith.select %161, %153, %149 : vector<1x1xi1>, vector<1x1xf32>
      %163 = arith.select %161, %150, %153 : vector<1x1xi1>, vector<1x1xf32>
      %c9_i32 = arith.constant 9 : i32
      %164 = arith.addf %162, %163 : vector<1x1xf32>
      %cst_59 = arith.constant 5.000000e-01 : f32
      %165 = vector.broadcast %cst_59 : f32 to vector<1x1xf32>
      %166 = arith.mulf %165, %164 : vector<1x1xf32>
      %167 = vector.broadcast %166 : vector<1x1xf32> to vector<1x256xf32>
      %168 = arith.cmpf oge, %38, %167 : vector<1x256xf32>
      %169 = arith.extui %168 : vector<1x256xi1> to vector<1x256xi32>
      %170 = arith.sitofp %169 : vector<1x256xi32> to vector<1x256xf32>
      %cst_60 = arith.constant dense<0.000000e+00> : vector<1xf32>
      %171 = vector.multi_reduction <add>, %170, %cst_60 [1] : vector<1x256xf32> to vector<1xf32>
      %172 = vector.shape_cast %171 : vector<1xf32> to vector<1x1xf32>
      %cst_61 = arith.constant 5.000000e+01 : f32
      %173 = vector.broadcast %cst_61 : f32 to vector<1x1xf32>
      %174 = arith.cmpf oge, %172, %173 : vector<1x1xf32>
      %175 = arith.select %174, %166, %162 : vector<1x1xi1>, vector<1x1xf32>
      %176 = arith.select %174, %163, %166 : vector<1x1xi1>, vector<1x1xf32>
      %c10_i32 = arith.constant 10 : i32
      %177 = arith.addf %175, %176 : vector<1x1xf32>
      %cst_62 = arith.constant 5.000000e-01 : f32
      %178 = vector.broadcast %cst_62 : f32 to vector<1x1xf32>
      %179 = arith.mulf %178, %177 : vector<1x1xf32>
      %180 = vector.broadcast %179 : vector<1x1xf32> to vector<1x256xf32>
      %181 = arith.cmpf oge, %38, %180 : vector<1x256xf32>
      %182 = arith.extui %181 : vector<1x256xi1> to vector<1x256xi32>
      %183 = arith.sitofp %182 : vector<1x256xi32> to vector<1x256xf32>
      %cst_63 = arith.constant dense<0.000000e+00> : vector<1xf32>
      %184 = vector.multi_reduction <add>, %183, %cst_63 [1] : vector<1x256xf32> to vector<1xf32>
      %185 = vector.shape_cast %184 : vector<1xf32> to vector<1x1xf32>
      %cst_64 = arith.constant 5.000000e+01 : f32
      %186 = vector.broadcast %cst_64 : f32 to vector<1x1xf32>
      %187 = arith.cmpf oge, %185, %186 : vector<1x1xf32>
      %188 = arith.select %187, %179, %175 : vector<1x1xi1>, vector<1x1xf32>
      %189 = arith.select %187, %176, %179 : vector<1x1xi1>, vector<1x1xf32>
      %c11_i32 = arith.constant 11 : i32
      %190 = arith.addf %188, %189 : vector<1x1xf32>
      %cst_65 = arith.constant 5.000000e-01 : f32
      %191 = vector.broadcast %cst_65 : f32 to vector<1x1xf32>
      %192 = arith.mulf %191, %190 : vector<1x1xf32>
      %193 = vector.broadcast %192 : vector<1x1xf32> to vector<1x256xf32>
      %194 = arith.cmpf oge, %38, %193 : vector<1x256xf32>
      %195 = arith.extui %194 : vector<1x256xi1> to vector<1x256xi32>
      %196 = arith.sitofp %195 : vector<1x256xi32> to vector<1x256xf32>
      %cst_66 = arith.constant dense<0.000000e+00> : vector<1xf32>
      %197 = vector.multi_reduction <add>, %196, %cst_66 [1] : vector<1x256xf32> to vector<1xf32>
      %198 = vector.shape_cast %197 : vector<1xf32> to vector<1x1xf32>
      %cst_67 = arith.constant 5.000000e+01 : f32
      %199 = vector.broadcast %cst_67 : f32 to vector<1x1xf32>
      %200 = arith.cmpf oge, %198, %199 : vector<1x1xf32>
      %201 = arith.select %200, %192, %188 : vector<1x1xi1>, vector<1x1xf32>
      %202 = arith.select %200, %189, %192 : vector<1x1xi1>, vector<1x1xf32>
      %c12_i32 = arith.constant 12 : i32
      %203 = arith.addf %201, %202 : vector<1x1xf32>
      %cst_68 = arith.constant 5.000000e-01 : f32
      %204 = vector.broadcast %cst_68 : f32 to vector<1x1xf32>
      %205 = arith.mulf %204, %203 : vector<1x1xf32>
      %206 = vector.broadcast %205 : vector<1x1xf32> to vector<1x256xf32>
      %207 = arith.cmpf oge, %38, %206 : vector<1x256xf32>
      %208 = arith.extui %207 : vector<1x256xi1> to vector<1x256xi32>
      %209 = arith.sitofp %208 : vector<1x256xi32> to vector<1x256xf32>
      %cst_69 = arith.constant dense<0.000000e+00> : vector<1xf32>
      %210 = vector.multi_reduction <add>, %209, %cst_69 [1] : vector<1x256xf32> to vector<1xf32>
      %211 = vector.shape_cast %210 : vector<1xf32> to vector<1x1xf32>
      %cst_70 = arith.constant 5.000000e+01 : f32
      %212 = vector.broadcast %cst_70 : f32 to vector<1x1xf32>
      %213 = arith.cmpf oge, %211, %212 : vector<1x1xf32>
      %214 = arith.select %213, %205, %201 : vector<1x1xi1>, vector<1x1xf32>
      %215 = arith.select %213, %202, %205 : vector<1x1xi1>, vector<1x1xf32>
      %c13_i32 = arith.constant 13 : i32
      %216 = arith.addf %214, %215 : vector<1x1xf32>
      %cst_71 = arith.constant 5.000000e-01 : f32
      %217 = vector.broadcast %cst_71 : f32 to vector<1x1xf32>
      %218 = arith.mulf %217, %216 : vector<1x1xf32>
      %219 = vector.broadcast %218 : vector<1x1xf32> to vector<1x256xf32>
      %220 = arith.cmpf oge, %38, %219 : vector<1x256xf32>
      %221 = arith.extui %220 : vector<1x256xi1> to vector<1x256xi32>
      %222 = arith.sitofp %221 : vector<1x256xi32> to vector<1x256xf32>
      %cst_72 = arith.constant dense<0.000000e+00> : vector<1xf32>
      %223 = vector.multi_reduction <add>, %222, %cst_72 [1] : vector<1x256xf32> to vector<1xf32>
      %224 = vector.shape_cast %223 : vector<1xf32> to vector<1x1xf32>
      %cst_73 = arith.constant 5.000000e+01 : f32
      %225 = vector.broadcast %cst_73 : f32 to vector<1x1xf32>
      %226 = arith.cmpf oge, %224, %225 : vector<1x1xf32>
      %227 = arith.select %226, %218, %214 : vector<1x1xi1>, vector<1x1xf32>
      %228 = arith.select %226, %215, %218 : vector<1x1xi1>, vector<1x1xf32>
      %c14_i32 = arith.constant 14 : i32
      %229 = arith.addf %227, %228 : vector<1x1xf32>
      %cst_74 = arith.constant 5.000000e-01 : f32
      %230 = vector.broadcast %cst_74 : f32 to vector<1x1xf32>
      %231 = arith.mulf %230, %229 : vector<1x1xf32>
      %232 = vector.broadcast %231 : vector<1x1xf32> to vector<1x256xf32>
      %233 = arith.cmpf oge, %38, %232 : vector<1x256xf32>
      %234 = arith.extui %233 : vector<1x256xi1> to vector<1x256xi32>
      %235 = arith.sitofp %234 : vector<1x256xi32> to vector<1x256xf32>
      %cst_75 = arith.constant dense<0.000000e+00> : vector<1xf32>
      %236 = vector.multi_reduction <add>, %235, %cst_75 [1] : vector<1x256xf32> to vector<1xf32>
      %237 = vector.shape_cast %236 : vector<1xf32> to vector<1x1xf32>
      %cst_76 = arith.constant 5.000000e+01 : f32
      %238 = vector.broadcast %cst_76 : f32 to vector<1x1xf32>
      %239 = arith.cmpf oge, %237, %238 : vector<1x1xf32>
      %240 = arith.select %239, %231, %227 : vector<1x1xi1>, vector<1x1xf32>
      %241 = arith.select %239, %228, %231 : vector<1x1xi1>, vector<1x1xf32>
      %c15_i32 = arith.constant 15 : i32
      %242 = arith.addf %240, %241 : vector<1x1xf32>
      %cst_77 = arith.constant 5.000000e-01 : f32
      %243 = vector.broadcast %cst_77 : f32 to vector<1x1xf32>
      %244 = arith.mulf %243, %242 : vector<1x1xf32>
      %245 = vector.broadcast %244 : vector<1x1xf32> to vector<1x256xf32>
      %246 = arith.cmpf oge, %38, %245 : vector<1x256xf32>
      %247 = arith.extui %246 : vector<1x256xi1> to vector<1x256xi32>
      %248 = arith.sitofp %247 : vector<1x256xi32> to vector<1x256xf32>
      %cst_78 = arith.constant dense<0.000000e+00> : vector<1xf32>
      %249 = vector.multi_reduction <add>, %248, %cst_78 [1] : vector<1x256xf32> to vector<1xf32>
      %250 = vector.shape_cast %249 : vector<1xf32> to vector<1x1xf32>
      %cst_79 = arith.constant 5.000000e+01 : f32
      %251 = vector.broadcast %cst_79 : f32 to vector<1x1xf32>
      %252 = arith.cmpf oge, %250, %251 : vector<1x1xf32>
      %253 = arith.select %252, %244, %240 : vector<1x1xi1>, vector<1x1xf32>
      %254 = arith.select %252, %241, %244 : vector<1x1xi1>, vector<1x1xf32>
      %c16_i32 = arith.constant 16 : i32
      %255 = arith.addf %253, %254 : vector<1x1xf32>
      %cst_80 = arith.constant 5.000000e-01 : f32
      %256 = vector.broadcast %cst_80 : f32 to vector<1x1xf32>
      %257 = arith.mulf %256, %255 : vector<1x1xf32>
      %258 = vector.broadcast %257 : vector<1x1xf32> to vector<1x256xf32>
      %259 = arith.cmpf oge, %38, %258 : vector<1x256xf32>
      %260 = arith.extui %259 : vector<1x256xi1> to vector<1x256xi32>
      %261 = arith.sitofp %260 : vector<1x256xi32> to vector<1x256xf32>
      %cst_81 = arith.constant dense<0.000000e+00> : vector<1xf32>
      %262 = vector.multi_reduction <add>, %261, %cst_81 [1] : vector<1x256xf32> to vector<1xf32>
      %263 = vector.shape_cast %262 : vector<1xf32> to vector<1x1xf32>
      %cst_82 = arith.constant 5.000000e+01 : f32
      %264 = vector.broadcast %cst_82 : f32 to vector<1x1xf32>
      %265 = arith.cmpf oge, %263, %264 : vector<1x1xf32>
      %266 = arith.select %265, %257, %253 : vector<1x1xi1>, vector<1x1xf32>
      %267 = arith.select %265, %254, %257 : vector<1x1xi1>, vector<1x1xf32>
      %c17_i32 = arith.constant 17 : i32
      %268 = arith.addf %266, %267 : vector<1x1xf32>
      %cst_83 = arith.constant 5.000000e-01 : f32
      %269 = vector.broadcast %cst_83 : f32 to vector<1x1xf32>
      %270 = arith.mulf %269, %268 : vector<1x1xf32>
      %271 = vector.broadcast %270 : vector<1x1xf32> to vector<1x256xf32>
      %272 = arith.cmpf oge, %38, %271 : vector<1x256xf32>
      %273 = arith.extui %272 : vector<1x256xi1> to vector<1x256xi32>
      %274 = arith.sitofp %273 : vector<1x256xi32> to vector<1x256xf32>
      %cst_84 = arith.constant dense<0.000000e+00> : vector<1xf32>
      %275 = vector.multi_reduction <add>, %274, %cst_84 [1] : vector<1x256xf32> to vector<1xf32>
      %276 = vector.shape_cast %275 : vector<1xf32> to vector<1x1xf32>
      %cst_85 = arith.constant 5.000000e+01 : f32
      %277 = vector.broadcast %cst_85 : f32 to vector<1x1xf32>
      %278 = arith.cmpf oge, %276, %277 : vector<1x1xf32>
      %279 = arith.select %278, %270, %266 : vector<1x1xi1>, vector<1x1xf32>
      %280 = arith.select %278, %267, %270 : vector<1x1xi1>, vector<1x1xf32>
      %c18_i32 = arith.constant 18 : i32
      %281 = arith.addf %279, %280 : vector<1x1xf32>
      %cst_86 = arith.constant 5.000000e-01 : f32
      %282 = vector.broadcast %cst_86 : f32 to vector<1x1xf32>
      %283 = arith.mulf %282, %281 : vector<1x1xf32>
      %284 = vector.broadcast %283 : vector<1x1xf32> to vector<1x256xf32>
      %285 = arith.cmpf oge, %38, %284 : vector<1x256xf32>
      %286 = arith.extui %285 : vector<1x256xi1> to vector<1x256xi32>
      %287 = arith.sitofp %286 : vector<1x256xi32> to vector<1x256xf32>
      %cst_87 = arith.constant dense<0.000000e+00> : vector<1xf32>
      %288 = vector.multi_reduction <add>, %287, %cst_87 [1] : vector<1x256xf32> to vector<1xf32>
      %289 = vector.shape_cast %288 : vector<1xf32> to vector<1x1xf32>
      %cst_88 = arith.constant 5.000000e+01 : f32
      %290 = vector.broadcast %cst_88 : f32 to vector<1x1xf32>
      %291 = arith.cmpf oge, %289, %290 : vector<1x1xf32>
      %292 = arith.select %291, %283, %279 : vector<1x1xi1>, vector<1x1xf32>
      %293 = arith.select %291, %280, %283 : vector<1x1xi1>, vector<1x1xf32>
      %c19_i32 = arith.constant 19 : i32
      %294 = arith.addf %292, %293 : vector<1x1xf32>
      %cst_89 = arith.constant 5.000000e-01 : f32
      %295 = vector.broadcast %cst_89 : f32 to vector<1x1xf32>
      %296 = arith.mulf %295, %294 : vector<1x1xf32>
      %297 = vector.broadcast %296 : vector<1x1xf32> to vector<1x256xf32>
      %298 = arith.cmpf oge, %38, %297 : vector<1x256xf32>
      %299 = arith.extui %298 : vector<1x256xi1> to vector<1x256xi32>
      %300 = arith.sitofp %299 : vector<1x256xi32> to vector<1x256xf32>
      %cst_90 = arith.constant dense<0.000000e+00> : vector<1xf32>
      %301 = vector.multi_reduction <add>, %300, %cst_90 [1] : vector<1x256xf32> to vector<1xf32>
      %302 = vector.shape_cast %301 : vector<1xf32> to vector<1x1xf32>
      %cst_91 = arith.constant 5.000000e+01 : f32
      %303 = vector.broadcast %cst_91 : f32 to vector<1x1xf32>
      %304 = arith.cmpf oge, %302, %303 : vector<1x1xf32>
      %305 = arith.select %304, %296, %292 : vector<1x1xi1>, vector<1x1xf32>
      %306 = arith.select %304, %293, %296 : vector<1x1xi1>, vector<1x1xf32>
      %307 = vector.broadcast %305 : vector<1x1xf32> to vector<1x256xf32>
      %308 = arith.cmpf oge, %38, %307 : vector<1x256xf32>
      %cst_92 = arith.constant -1.000000e+30 : f32
      %309 = vector.broadcast %cst_92 : f32 to vector<1x256xf32>
      %310 = arith.select %308, %38, %309 : vector<1x256xi1>, vector<1x256xf32>
      %cst_93 = arith.constant dense<0xFF800000> : vector<1xf32>
      %311 = vector.multi_reduction <maximumf>, %310, %cst_93 [1] : vector<1x256xf32> to vector<1xf32>
      %312 = vector.shape_cast %311 : vector<1xf32> to vector<1x1xf32>
      %313 = vector.broadcast %312 : vector<1x1xf32> to vector<1x256xf32>
      %314 = arith.subf %310, %313 : vector<1x256xf32>
      %315 = math.exp %314 : vector<1x256xf32>
      %cst_94 = arith.constant dense<0.000000e+00> : vector<1xf32>
      %316 = vector.multi_reduction <add>, %315, %cst_94 [1] : vector<1x256xf32> to vector<1xf32>
      %317 = vector.shape_cast %316 : vector<1xf32> to vector<1x1xf32>
      %318 = tpu.reciprocal %317 {approx = true} : vector<1x1xf32> -> vector<1x1xf32>
      %319 = arith.mulf %317, %318 : vector<1x1xf32>
      %cst_95 = arith.constant 2.000000e+00 : f32
      %320 = vector.broadcast %cst_95 : f32 to vector<1x1xf32>
      %321 = arith.subf %320, %319 : vector<1x1xf32>
      %322 = arith.mulf %318, %321 : vector<1x1xf32>
      %323 = vector.broadcast %322 : vector<1x1xf32> to vector<1x256xf32>
      %324 = arith.mulf %315, %323 : vector<1x256xf32>
      %c0_96 = arith.constant 0 : index
      %c0_97 = arith.constant 0 : index
      %325 = vector.load %arg9[%c0_96, %c0_97] : memref<1x256xf32, #tpu.memory_space<vmem>>, vector<1x256xf32>
      tpu.vector_store %arg9[%c0_96, %c0_97], %324 {strides = array<i32>} : memref<1x256xf32, #tpu.memory_space<vmem>>, vector<1x256xf32>,
      %c1_i32_98 = arith.constant 1 : i32
      %326 = arith.muli %arg0, %c1_i32_98 : i32
      %327 = tpu.assume_multiple %326, 1 : i32
      %c0_i32_99 = arith.constant 0 : i32
      %328 = tpu.memref_slice %arg7[%327, %c0_i32_99] : memref<1x256xf32, #tpu.memory_space<any>> -> memref<1x256xf32, #tpu.memory_space<any>>
      tpu.wait_dma2 semaphore(%arg14 : memref<!tpu.dma_semaphore, #tpu.memory_space<semaphore_mem>>) src(%328 : memref<1x256xf32, #tpu.memory_space<any>>) dst(%arg13 : memref<1x256xf32, #tpu.memory_space<vmem>>)
      %c0_100 = arith.constant 0 : index
      %c0_101 = arith.constant 0 : index
      %329 = vector.load %arg13[%c0_100, %c0_101] : memref<1x256xf32, #tpu.memory_space<vmem>>, vector<1x256xf32>
      %330 = arith.addf %310, %329 : vector<1x256xf32>
      %331 = tpu.iota {dimensions = array<i32: 1>} : vector<1x256xi32>
      %cst_102 = arith.constant dense<0xFF800000> : vector<1xf32>
      %332 = vector.multi_reduction <maximumf>, %330, %cst_102 [1] : vector<1x256xf32> to vector<1xf32>
      %333 = vector.shape_cast %332 : vector<1xf32> to vector<1x1xf32>
      %334 = vector.broadcast %333 : vector<1x1xf32> to vector<1x256xf32>
      %335 = arith.cmpf oge, %330, %334 : vector<1x256xf32>
      %c256_i32_103 = arith.constant 256 : i32
      %336 = vector.broadcast %c256_i32_103 : i32 to vector<1x256xi32>
      %337 = arith.select %335, %331, %336 : vector<1x256xi1>, vector<1x256xi32>
      %cst_104 = arith.constant dense<2147483647> : vector<1xi32>
      %338 = vector.multi_reduction <minsi>, %337, %cst_104 [1] : vector<1x256xi32> to vector<1xi32>
      %339 = vector.shape_cast %338 : vector<1xi32> to vector<1x1xi32>
      %340 = vector.shape_cast %339 : vector<1x1xi32> to vector<1x1xi32>
      %341 = vector.broadcast %340 : vector<1x1xi32> to vector<1x128xi32>
      %c0_105 = arith.constant 0 : index
      %c0_106 = arith.constant 0 : index
      %342 = vector.load %arg8[%c0_105, %c0_106] : memref<1x128xi32, #tpu.memory_space<vmem>>, vector<1x128xi32>
      tpu.vector_store %arg8[%c0_105, %c0_106], %341 {strides = array<i32>} : memref<1x128xi32, #tpu.memory_space<vmem>>, vector<1x128xi32>,
    } else {
    }
    return
  }
  func.func @transform_0(%arg0: i32, %arg1: i32) -> (i32, i32) {
    %c0_i32 = arith.constant 0 : i32
    %c0_i32_0 = arith.constant 0 : i32
    return %arg0, %c0_i32 : i32, i32
  }
  func.func @transform_1(%arg0: i32, %arg1: i32) -> (i32, i32) {
    %c0_i32 = arith.constant 0 : i32
    %c0_i32_0 = arith.constant 0 : i32
    %c0_i32_1 = arith.constant 0 : i32
    return %c0_i32, %c0_i32_0 : i32, i32
  }
  func.func @transform_2(%arg0: i32, %arg1: i32) -> (i32, i32) {
    %c0_i32 = arith.constant 0 : i32
    %c0_i32_0 = arith.constant 0 : i32
    %c0_i32_1 = arith.constant 0 : i32
    return %c0_i32, %c0_i32_0 : i32, i32
  }
  func.func @transform_3(%arg0: i32, %arg1: i32) -> (i32, i32) {
    %c0_i32 = arith.constant 0 : i32
    %c0_i32_0 = arith.constant 0 : i32
    return %c0_i32, %arg1 : i32, i32
  }
  func.func @transform_4(%arg0: i32, %arg1: i32) -> (i32, i32) {
    %c0_i32 = arith.constant 0 : i32
    %c0_i32_0 = arith.constant 0 : i32
    %c0_i32_1 = arith.constant 0 : i32
    return %c0_i32, %c0_i32_0 : i32, i32
  }
  func.func @transform_6(%arg0: i32, %arg1: i32) -> (i32, i32) {
    %c0_i32 = arith.constant 0 : i32
    %c0_i32_0 = arith.constant 0 : i32
    return %arg0, %c0_i32 : i32, i32
  }
  func.func @transform_7(%arg0: i32, %arg1: i32) -> (i32, i32) {
    %c0_i32 = arith.constant 0 : i32
    %c0_i32_0 = arith.constant 0 : i32
    return %arg0, %c0_i32 : i32, i32
  }
}

</mosaic_0001>

<bundles_post_ra>
// kernel: tpu_custom_call.1
= control target key start
LH: loop header
LB: loop body
LE: loop exit
PB: predicated region body
PF: predicated region fallthrough
CT: control target
= control target key end

     0   :  { %13 = vsyncpa [#allocation8], 0  ;;  %s1822_s0 = inlined_call_operand.hbm [shape: f32[1,128], index: 0, kind: input, shape index: {}]   ;;  %s1823_s1 = inlined_call_operand.hbm [shape: bf16[128,128], index: 1, kind: input, shape index: {}]   ;;  %s1824_s2 = inlined_call_operand.vmem [shape: f32[1,128], index: 2, kind: input, shape index: {}]   ;;  %s1825_s3 = inlined_call_operand.hbm [shape: bf16[128,256], index: 3, kind: input, shape index: {}]   ;;  %s1826_s4 = inlined_call_operand.vmem [shape: f32[1,256], index: 4, kind: input, shape index: {}]   ;;  %s1827_s5 = inlined_call_operand.vmem [shape: f32[1,256], index: 5, kind: input, shape index: {}]   ;;  %s1828_s6 = inlined_call_operand.hbm [shape: s32[1,128], index: 6, kind: output, shape index: {0}]   ;;  %s1829_s7 = inlined_call_operand.hbm [shape: f32[1,256], index: 7, kind: output, shape index: {1}]  }
   0x1   :  { %14 = vsyncpa [#allocation11], 0 }
   0x2   :  { %15 = vsyncpa [#allocation9], 0 }
   0x3   :  { %16 = vsyncpa [#allocation15], 0  ;;  %s1534_s24 = smov [#allocation10]  }
   0x4   :  { %s32_s25 = sshll.u32 %s1534_s24, 4  ;;  %s33_s25 = int_to_ptr.vmem [resolvable:$true] %s32_s25 }
   0x5   :  { %s1432_s26 = scalar_lea.vmem %s33_s25, 1024  ;;  %p1437_p1 = scmp.lt.s32.totalorder %s33_s25, %s33_s25 }
   0x6   :  { %p1433_p0 = scmp.ne.s32.totalorder %s33_s25, %s1432_s26  ;;  %p1438_p2 = scmp.lt.s32.totalorder %s1432_s26, %s1432_s26 }
   0x8   :  { %p1439_p3 = por %p1438_p2, %p1437_p1 }
   0xa   :  { %p1440_p4 = pnand %p1439_p3, %p1433_p0 }
   0xc   :  { %1443 = shalt.err (!%p1440_p4)
}
   0xd   :  { %s1535_s27 = smov 64   ;;  %s1536_s28 = smov 4  }
   0xe   :  { %38 = dma.hbm_to_vmem [thread:$0]  %s1823_s1, 1024, %s33_s25, [#allocation11], %s1535_s27, %s1535_s27, %s1536_s28  }
   0xf   :  { %s1537_s8 = smov [#allocation7]   ;;  %s1538_s10 = smov [#allocation12]  }
  0x10   :  { %s23_s9 = sshll.u32 %s1537_s8, 4  ;;  %s46_s11 = sshll.u32 %s1538_s10, 4  ;;  %s24_s9 = int_to_ptr.vmem [resolvable:$true] %s23_s9  ;;  %s47_s11 = int_to_ptr.vmem [resolvable:$true] %s46_s11 }
  0x11   :  { %s1452_s12 = scalar_lea.vmem %s24_s9, 16  ;;  %s1456_s13 = scalar_lea.vmem %s24_s9, 32 }
  0x12   :  { %p1453_p5 = scmp.ne.s32.totalorder %s24_s9, %s1452_s12  ;;  %p1457_p6 = scmp.lt.s32.totalorder %s24_s9, %s24_s9 }
  0x13   :  { %p1458_p7 = scmp.lt.s32.totalorder %s1456_s13, %s1452_s12 }
  0x15   :  { %p1459_p8 = por %p1458_p7, %p1457_p6 }
  0x17   :  { %p1460_p9 = pnand %p1459_p8, %p1453_p5 }
  0x19   :  { %1463 = shalt.err (!%p1460_p9)
}
  0x1a   :  { %26 = dma.hbm_to_vmem [thread:$0]  %s1822_s0, 16, %s24_s9, [#allocation8]  }
  0x1b   :  { %s1472_s16 = scalar_lea.vmem %s47_s11, 2048  ;;  %p1477_p11 = scmp.lt.s32.totalorder %s47_s11, %s47_s11 }
  0x1c   :  { %p1473_p10 = scmp.ne.s32.totalorder %s47_s11, %s1472_s16  ;;  %p1478_p12 = scmp.lt.s32.totalorder %s1472_s16, %s1472_s16 }
  0x1e   :  { %p1479_p13 = por %p1478_p12, %p1477_p11 }
  0x20   :  { %p1480_p0 = pnand %p1479_p13, %p1473_p10 }
  0x22   :  { %1483 = shalt.err (!%p1480_p0)
}
  0x23   :  { %s1539_s1 = smov 128   ;;  %s1540_s17 = smov 8  }
  0x24   :  { %52 = dma.hbm_to_vmem [thread:$0]  %s1825_s3, 2048, %s47_s11, [#allocation11], %s1539_s1, %s1539_s1, %s1540_s17  }
  0x25   :  { %1524 = dma.done.wait [#allocation8], 16  }
  0x26   :  { %1525 = vsyncadd [#allocation8], 4294967280 }
  0x27   :  { %1526 = dma.done.wait [#allocation11], 3072  }
  0x28   :  { %1527 = vsyncadd [#allocation11], 4294964224  ;;  %vm184_vm0 = vcmask 0   ;;  %v1541_v0 = vmov 3e+38   ;;  %v1542_v1 = vmov 0.0  }
  0x29   :  { %185 = vst.msk [vmem:[#allocation3] sm:$0x1] %vm184_vm0, %v1541_v0  ;;  %1349 = vmatprep.subr.bf16.mxu0 %v1542_v1  ;;  %v1543_v2 = vmov -3e+38   ;;  %vm1544_vm1 = vmmov 0   ;;  %v1384_v4 = vld [vmem:[#allocation10 + $0x38] sm:$0xff]  }
  0x2a   :  { %186 = vst.msk [vmem:[#allocation4] sm:$0x1] %vm184_vm0, %v1543_v2  ;;  %1365 = vmatprep.mubr.msk.bf16.mxu0 %vm1544_vm1, %v1542_v1  ;;  %v207_v3 = vld [vmem:[%s1827_s5] sm:$0x3]  ;;  %1350 = vmatpush3.bf16.msra.mxu0 %v1384_v4  ;;  %v1385_v5 = vld [vmem:[#allocation10 + $0x30] sm:$0xff]   ;;  %v1386_v6 = vld [vmem:[#allocation10 + $0x28] sm:$0xff]  }
  0x2b   :  { %208 = vst [vmem:[#allocation5] sm:$0x3] %v207_v3  ;;  %1351 = vmatprep.subr.bf16.mxu0 %v1542_v1  ;;  %v1387_v7 = vld [vmem:[#allocation10 + $0x20] sm:$0xff]   ;;  %v1388_v8 = vld [vmem:[#allocation10 + $0x18] sm:$0xff]   ;;  %v1389_v9 = vld [vmem:[#allocation10 + $0x10] sm:$0xff]   ;;  %vm178_vm2 = vcmask 1040384  }
  0x2c   :  { %v1390_v10 = vld [vmem:[#allocation10 + $0x8] sm:$0xff]   ;;  %v1391_v11 = vld [vmem:[#allocation10] sm:$0xff]   ;;  %v69_v12 = vld [vmem:[#allocation7] sm:$0x1]  ;;  %vm179_vm3 = vsmask.f32 256 }
  0x2d   :  { %v70_v13 = vpack.c.bf16 %v69_v12, %v69_v12  ;;  %v87_v14 = vld [vmem:[%s1824_s2] sm:$0x1]  ;;  %vm180_vm4 = vmand %vm178_vm2, %vm179_vm3 }
  0x2e   :  { %1352 = vmatpush3.bf16.msra.mxu0 %v1385_v5  ;;  %v181_v21 = vld [vmem:[#allocation2] sm:$0x1] }
  0x2f   :  { %1353 = vmatprep.subr.bf16.mxu0 %v1542_v1 }
  0x32   :  { %1354 = vmatpush3.bf16.msra.mxu0 %v1386_v6 }
  0x33   :  { %1355 = vmatprep.subr.bf16.mxu0 %v1542_v1 }
  0x36   :  { %1356 = vmatpush3.bf16.msra.mxu0 %v1387_v7 }
  0x37   :  { %1357 = vmatprep.subr.bf16.mxu0 %v1542_v1 }
  0x3a   :  { %1358 = vmatpush3.bf16.msra.mxu0 %v1388_v8 }
  0x3b   :  { %1359 = vmatprep.subr.bf16.mxu0 %v1542_v1 }
  0x3e   :  { %1360 = vmatpush3.bf16.msra.mxu0 %v1389_v9 }
  0x3f   :  { %1361 = vmatprep.subr.bf16.mxu0 %v1542_v1 }
  0x42   :  { %1362 = vmatpush3.bf16.msra.mxu0 %v1390_v10 }
  0x43   :  { %1363 = vmatprep.subr.bf16.mxu0 %v1542_v1 }
  0x46   :  { %1364 = vmatpush3.bf16.msra.mxu0 %v1391_v11 }
  0x49   :  { %1366 = vmatmul.mubr.bf16.vlgmr.msra.gmra.mxu0 %v70_v13 }
 0x109   :  { %v170_v15 = vpop.f32.mrf.mxu0 }
 0x10a   :  { %v171_v16 = vadd.f32 %v170_v15, %v87_v14 }
 0x10b   :  { %v1367_v17 = vpop.f32.mrf.mxu0 }
 0x10c   :  { %1392 = vtanh.f32 %v171_v16 }
 0x10d   :  { %v173_v18 = vpop.f32.mrf.mxu0 }
 0x10f   :  { %v1368_v19 = vpop.f32.mrf.mxu0 }
 0x119   :  { %v1393_v20 = vpop.eup %1392 }
 0x11a   :  { %v177_v22 = vpack.c.bf16 %v1393_v20, %v1393_v20 }
 0x11c   :  { %v182_v23 = vsel %vm180_vm4, %v177_v22, %v181_v21 }
 0x11d   :  { %183 = vst [vmem:[#allocation2] sm:$0x1] %v182_v23 }
 0x11e   :  { %234 = vsyncadd [#allocation6], 32  ;;  %v1396_v24 = vld [vmem:[#allocation12 + $0x74] ss:$8 sps:$4 sm:$0xff]   ;;  %v1398_v25 = vld [vmem:[#allocation12 + $0x70] ss:$8 sps:$4 sm:$0xff]   ;;  %v338_v42 = vlaneseq }
 0x11f   :  { %v1545_v26 = vmov 0   ;;  %v1399_v27 = vld [vmem:[#allocation12 + $0x64] ss:$8 sps:$4 sm:$0xff]   ;;  %348 = vmatprep.subr.bf16.mxu1 %v1396_v24  ;;  %v1401_v28 = vld [vmem:[#allocation12 + $0x60] ss:$8 sps:$4 sm:$0xff]  }
 0x120   :  { %380 = vmatprep.mubr.bf16.mxu1 %v1545_v26  ;;  %1394 = vset.pattern.permute.xlu1 %v1545_v26  ;;  %v1402_v29 = vld [vmem:[#allocation12 + $0x54] ss:$8 sps:$4 sm:$0xff]   ;;  %v1404_v30 = vld [vmem:[#allocation12 + $0x50] ss:$8 sps:$4 sm:$0xff]   ;;  %v1405_v31 = vld [vmem:[#allocation12 + $0x44] ss:$8 sps:$4 sm:$0xff]  }
 0x121   :  { %1395 = vset.pattern.permute.xlu0 %v1545_v26  ;;  %349 = vmatpush1.bf16.msra.mxu1 %v1398_v25  ;;  %v1407_v32 = vld [vmem:[#allocation12 + $0x40] ss:$8 sps:$4 sm:$0xff]   ;;  %v1408_v33 = vld [vmem:[#allocation12 + $0x34] ss:$8 sps:$4 sm:$0xff]   ;;  %v1410_v34 = vld [vmem:[#allocation12 + $0x30] ss:$8 sps:$4 sm:$0xff]  }
 0x122   :  { %350 = vmatprep.subr.bf16.mxu1 %v1399_v27  ;;  %v1411_v35 = vld [vmem:[#allocation12 + $0x24] ss:$8 sps:$4 sm:$0xff]   ;;  %v1413_v36 = vld [vmem:[#allocation12 + $0x20] ss:$8 sps:$4 sm:$0xff]   ;;  %v1414_v37 = vld [vmem:[#allocation12 + $0x14] ss:$8 sps:$4 sm:$0xff]  }
 0x123   :  { %v1416_v38 = vld [vmem:[#allocation12 + $0x10] ss:$8 sps:$4 sm:$0xff]   ;;  %v1417_v39 = vld [vmem:[#allocation12 + $0x4] ss:$8 sps:$4 sm:$0xff]   ;;  %v1419_v40 = vld [vmem:[#allocation12] ss:$8 sps:$4 sm:$0xff]  }
 0x124   :  { %v236_v41 = vld [vmem:[#allocation2] sm:$0x1]  ;;  %v1616_v43 = vand.u32 127, %v338_v42  ;;  %v339_v45 = vshrl.u32 %v338_v42, 7  ;;  %v1546_v49 = vmov 1966171168  }
 0x125   :  { %351 = vmatpush1.bf16.msra.mxu1 %v1401_v28  ;;  %v256_v47 = vld [vmem:[%s1826_s4] sm:$0x3]  ;;  %v393_v50 = vunpack.c.l.s4 %v1546_v49  ;;  %vm1636_vm5 = vcmp.lt.s32.totalorder %v338_v42, 256  ;;  %v433_v8 = vld [vmem:[#allocation4] sm:$0x1] }
 0x126   :  { %352 = vmatprep.subr.bf16.mxu1 %v1402_v29  ;;  %v1619_v44 = vadd.s32 128, %v1616_v43  ;;  %v1621_v46 = vsub.s32 0, %v339_v45  ;;  %v1626_v48 = vsub.s32 1, %v339_v45  ;;  %v421_v11 = vld [vmem:[#allocation3] sm:$0x1] }
 0x127   :  { %v394_v53 = vunpack.c.0.s8 %v393_v50 }
 0x128   :  { %v341_v51 = vrot.slane %v256_v47, %v1621_v46  ;;  %v345_v52 = vrot.slane %v256_v47, %v1626_v48 }
 0x129   :  { %353 = vmatpush1.bf16.msra.mxu1 %v1404_v30  ;;  %v1630_v58 = vsub.s32 %v394_v53, %v339_v45 }
 0x12a   :  { %354 = vmatprep.subr.bf16.mxu1 %v1405_v31 }
 0x12d   :  { %355 = vmatpush1.bf16.msra.mxu1 %v1407_v32 }
 0x12e   :  { %356 = vmatprep.subr.bf16.mxu1 %v1408_v33 }
 0x131   :  { %357 = vmatpush1.bf16.msra.mxu1 %v1410_v34 }
 0x132   :  { %358 = vmatprep.subr.bf16.mxu1 %v1411_v35 }
 0x135   :  { %359 = vmatpush1.bf16.msra.mxu1 %v1413_v36 }
 0x136   :  { %360 = vmatprep.subr.bf16.mxu1 %v1414_v37 }
 0x139   :  { %361 = vmatpush1.bf16.msra.mxu1 %v1416_v38 }
 0x13a   :  { %362 = vmatprep.subr.bf16.mxu1 %v1417_v39 }
 0x13d   :  { %363 = vmatpush1.bf16.msra.mxu1 %v1419_v40 }
 0x140   :  { %381 = vmatmul.mubr.bf16.vlgmr.msra.gmra.mxu1 %v236_v41 }
 0x200   :  { %v382_v54 = vpop.f32.mrf.mxu1 }
 0x201   :  { %v383_v55 = vadd.f32 %v382_v54, %v341_v51 }
 0x202   :  { %v384_v56 = vpop.f32.mrf.mxu1 }
 0x203   :  { %v385_v57 = vadd.f32 %v384_v56, %v345_v52  ;;  %v436_v61 = vsel %vm178_vm2, %v383_v55, -inf  ;;  %v425_v6 = vsel %vm178_vm2, %v383_v55, inf }
 0x204   :  { %v386_v59 = vpop.f32.mrf.mxu1 }
 0x205   :  { %v391_v60 = vcombine.low %v383_v55, %v385_v57  ;;  %v437_v62 = vsel %vm178_vm2, %v385_v57, -inf  ;;  %v426_v3 = vsel %vm178_vm2, %v385_v57, inf }
 0x206   :  { %v387_v63 = vpop.f32.mrf.mxu1  ;;  %v438_v0 = vmax.f32 %v436_v61, %v437_v62  ;;  %v427_v7 = vmin.f32 %v425_v6, %v426_v3 }
 0x207   :  { %v398_v2 = vrot.slane %v391_v60, %v1630_v58 }
 0x208   :  { %439 = vmax.xlane.f32.xlu0 %v438_v0 }
 0x209   :  { %v405_v5 = vrot.slane %v398_v2, %v1630_v58 }
 0x20b   :  { %412 = vst.msk [vmem:[#allocation14] sm:$0x3] %vm1636_vm5, %v405_v5 }
 0x20c   :  { %428 = vmin.xlane.f32.xlu0 %v427_v7 }
 0x212   :  { %v1647_v24 = vld [vmem:[#allocation14] sm:$0x3] }
 0x291   :  { %v440_v9 = vpop.xlane.xlu0 %439 }
 0x292   :  { %v441_v10 = vmax.f32 %v433_v8, %v440_v9 }
 0x294   :  { %442 = vst.msk [vmem:[#allocation4] sm:$0x1] %vm184_vm0, %v441_v10 }
 0x295   :  { %v429_v12 = vpop.xlane.xlu0 %428 }
 0x296   :  { %v430_v13 = vmin.f32 %v421_v11, %v429_v12 }
 0x298   :  { %432 = vst.msk [vmem:[#allocation3] sm:$0x1] %vm184_vm0, %v430_v13 }
 0x29b   :  { %v448_v14 = vld [vmem:[#allocation4] sm:$0x1] }
 0x29c   :  { %v449_v15 = vand.u32 2147483647, %v448_v14 }
 0x29e   :  { %v450_v16 = vmul.f32 1e-06, %v449_v15 }
 0x29f   :  { %v447_v19 = vld [vmem:[#allocation3] sm:$0x1] }
 0x2a0   :  { %v451_v17 = vmax.f32 %v450_v16, 1e-06 }
 0x2a2   :  { %v452_v18 = vadd.f32 %v451_v17, %v448_v14 }
 0x2a4   :  { %v453_v20 = vadd.f32 %v452_v18, %v447_v19 }
 0x2a6   :  { %v454_v21 = vmul.f32 0.5, %v453_v20 }
 0x2a8   :  { %457 = vperm.xlu1 %1394, %v454_v21  }
 0x323   :  { %v458_v22 = vpop.permute.xlu1 %457 }
 0x324   :  { %v463_v23 = vrot.slane %v458_v22, %v1621_v46 }
 0x326   :  { %vm464_vm6 = vcmp.ge.f32.partialorder %v1647_v24, %v463_v23 }
 0x327   :  { %v1319_v25 = vsel %vm464_vm6, 1.0, %v1542_v1 }
 0x328   :  { %v471_v26 = vrot.slane %v1319_v25, %v1621_v46  ;;  %v475_v27 = vrot.slane %v1319_v25, %v1626_v48 }
 0x32a   :  { %v478_v28 = vsel %vm178_vm2, %v471_v26, 0.0  ;;  %v479_v29 = vsel %vm178_vm2, %v475_v27, 0.0 }
 0x32b   :  { %v480_v30 = vadd.f32 %v479_v29, %v478_v28 }
 0x32d   :  { %481 = vadd.xlane.f32.xlu1 %v480_v30 }
 0x3b6   :  { %v482_v31 = vpop.xlane.xlu1 %481 }
 0x3b7   :  { %vm483_vm7 = vcmp.ge.f32.partialorder %v482_v31, 50.0 }
 0x3b8   :  { %v484_v32 = vsel %vm483_vm7, %v454_v21, %v447_v19  ;;  %v485_v33 = vsel %vm483_vm7, %v452_v18, %v454_v21 }
 0x3b9   :  { %v486_v34 = vadd.f32 %v485_v33, %v484_v32 }
 0x3bb   :  { %v487_v35 = vmul.f32 0.5, %v486_v34 }
 0x3bd   :  { %490 = vperm.xlu0 %1395, %v487_v35  }
 0x438   :  { %v491_v36 = vpop.permute.xlu0 %490 }
 0x439   :  { %v495_v37 = vrot.slane %v491_v36, %v1621_v46 }
 0x43b   :  { %vm497_vm8 = vcmp.ge.f32.partialorder %v1647_v24, %v495_v37 }
 0x43c   :  { %v1320_v38 = vsel %vm497_vm8, 1.0, %v1542_v1 }
 0x43d   :  { %v504_v39 = vrot.slane %v1320_v38, %v1621_v46  ;;  %v508_v40 = vrot.slane %v1320_v38, %v1626_v48 }
 0x43f   :  { %v511_v41 = vsel %vm178_vm2, %v504_v39, 0.0  ;;  %v512_v42 = vsel %vm178_vm2, %v508_v40, 0.0 }
 0x440   :  { %v513_v45 = vadd.f32 %v512_v42, %v511_v41 }
 0x442   :  { %514 = vadd.xlane.f32.xlu1 %v513_v45 }
 0x4cb   :  { %v515_v47 = vpop.xlane.xlu1 %514 }
 0x4cc   :  { %vm516_vm9 = vcmp.ge.f32.partialorder %v515_v47, 50.0 }
 0x4cd   :  { %v517_v49 = vsel %vm516_vm9, %v487_v35, %v484_v32  ;;  %v518_v50 = vsel %vm516_vm9, %v485_v33, %v487_v35 }
 0x4ce   :  { %v519_v51 = vadd.f32 %v518_v50, %v517_v49 }
 0x4d0   :  { %v520_v52 = vmul.f32 0.5, %v519_v51 }
 0x4d2   :  { %523 = vperm.xlu1 %1394, %v520_v52  }
 0x54d   :  { %v524_v53 = vpop.permute.xlu1 %523 }
 0x54e   :  { %v528_v54 = vrot.slane %v524_v53, %v1621_v46 }
 0x550   :  { %vm530_vm10 = vcmp.ge.f32.partialorder %v1647_v24, %v528_v54 }
 0x551   :  { %v1321_v55 = vsel %vm530_vm10, 1.0, %v1542_v1 }
 0x552   :  { %v537_v56 = vrot.slane %v1321_v55, %v1621_v46  ;;  %v541_v57 = vrot.slane %v1321_v55, %v1626_v48 }
 0x554   :  { %v544_v59 = vsel %vm178_vm2, %v537_v56, 0.0  ;;  %v545_v60 = vsel %vm178_vm2, %v541_v57, 0.0 }
 0x555   :  { %v546_v61 = vadd.f32 %v545_v60, %v544_v59 }
 0x557   :  { %547 = vadd.xlane.f32.xlu0 %v546_v61 }
 0x5e0   :  { %v548_v62 = vpop.xlane.xlu0 %547 }
 0x5e1   :  { %vm549_vm11 = vcmp.ge.f32.partialorder %v548_v62, 50.0 }
 0x5e2   :  { %v550_v63 = vsel %vm549_vm11, %v520_v52, %v517_v49  ;;  %v551_v0 = vsel %vm549_vm11, %v518_v50, %v520_v52 }
 0x5e3   :  { %v552_v2 = vadd.f32 %v551_v0, %v550_v63 }
 0x5e5   :  { %v553_v3 = vmul.f32 0.5, %v552_v2 }
 0x5e7   :  { %556 = vperm.xlu1 %1394, %v553_v3  }
 0x662   :  { %v557_v5 = vpop.permute.xlu1 %556 }
 0x663   :  { %v561_v6 = vrot.slane %v557_v5, %v1621_v46 }
 0x665   :  { %vm563_vm12 = vcmp.ge.f32.partialorder %v1647_v24, %v561_v6 }
 0x666   :  { %v1322_v7 = vsel %vm563_vm12, 1.0, %v1542_v1 }
 0x667   :  { %v570_v8 = vrot.slane %v1322_v7, %v1621_v46  ;;  %v574_v9 = vrot.slane %v1322_v7, %v1626_v48 }
 0x669   :  { %v577_v10 = vsel %vm178_vm2, %v570_v8, 0.0  ;;  %v578_v11 = vsel %vm178_vm2, %v574_v9, 0.0 }
 0x66a   :  { %v579_v12 = vadd.f32 %v578_v11, %v577_v10 }
 0x66c   :  { %580 = vadd.xlane.f32.xlu1 %v579_v12 }
 0x6f5   :  { %v581_v13 = vpop.xlane.xlu1 %580 }
 0x6f6   :  { %vm582_vm13 = vcmp.ge.f32.partialorder %v581_v13, 50.0 }
 0x6f7   :  { %v583_v14 = vsel %vm582_vm13, %v553_v3, %v550_v63  ;;  %v584_v15 = vsel %vm582_vm13, %v551_v0, %v553_v3 }
 0x6f8   :  { %v585_v16 = vadd.f32 %v584_v15, %v583_v14 }
 0x6fa   :  { %v586_v17 = vmul.f32 0.5, %v585_v16 }
 0x6fc   :  { %589 = vperm.xlu0 %1395, %v586_v17  }
 0x777   :  { %v590_v18 = vpop.permute.xlu0 %589 }
 0x778   :  { %v594_v19 = vrot.slane %v590_v18, %v1621_v46 }
 0x77a   :  { %vm596_vm14 = vcmp.ge.f32.partialorder %v1647_v24, %v594_v19 }
 0x77b   :  { %v1323_v20 = vsel %vm596_vm14, 1.0, %v1542_v1 }
 0x77c   :  { %v603_v21 = vrot.slane %v1323_v20, %v1621_v46  ;;  %v607_v22 = vrot.slane %v1323_v20, %v1626_v48 }
 0x77e   :  { %v610_v23 = vsel %vm178_vm2, %v603_v21, 0.0  ;;  %v611_v25 = vsel %vm178_vm2, %v607_v22, 0.0 }
 0x77f   :  { %v612_v26 = vadd.f32 %v611_v25, %v610_v23 }
 0x781   :  { %613 = vadd.xlane.f32.xlu1 %v612_v26 }
 0x80a   :  { %v614_v27 = vpop.xlane.xlu1 %613 }
 0x80b   :  { %vm615_vm15 = vcmp.ge.f32.partialorder %v614_v27, 50.0 }
 0x80c   :  { %v616_v28 = vsel %vm615_vm15, %v586_v17, %v583_v14  ;;  %v617_v29 = vsel %vm615_vm15, %v584_v15, %v586_v17 }
 0x80d   :  { %v618_v30 = vadd.f32 %v617_v29, %v616_v28 }
 0x80f   :  { %v619_v31 = vmul.f32 0.5, %v618_v30 }
 0x811   :  { %622 = vperm.xlu0 %1395, %v619_v31  }
 0x88c   :  { %v623_v32 = vpop.permute.xlu0 %622 }
 0x88d   :  { %v627_v33 = vrot.slane %v623_v32, %v1621_v46 }
 0x88f   :  { %vm629_vm0 = vcmp.ge.f32.partialorder %v1647_v24, %v627_v33 }
 0x890   :  { %v1324_v34 = vsel %vm629_vm0, 1.0, %v1542_v1 }
 0x891   :  { %v636_v35 = vrot.slane %v1324_v34, %v1621_v46  ;;  %v640_v36 = vrot.slane %v1324_v34, %v1626_v48 }
 0x893   :  { %v643_v37 = vsel %vm178_vm2, %v636_v35, 0.0  ;;  %v644_v38 = vsel %vm178_vm2, %v640_v36, 0.0 }
 0x894   :  { %v645_v39 = vadd.f32 %v644_v38, %v643_v37 }
 0x896   :  { %646 = vadd.xlane.f32.xlu1 %v645_v39 }
 0x91f   :  { %v647_v40 = vpop.xlane.xlu1 %646 }
 0x920   :  { %vm648_vm1 = vcmp.ge.f32.partialorder %v647_v40, 50.0 }
 0x921   :  { %v649_v41 = vsel %vm648_vm1, %v619_v31, %v616_v28  ;;  %v650_v42 = vsel %vm648_vm1, %v617_v29, %v619_v31 }
 0x922   :  { %v651_v45 = vadd.f32 %v650_v42, %v649_v41 }
 0x924   :  { %v652_v47 = vmul.f32 0.5, %v651_v45 }
 0x926   :  { %655 = vperm.xlu0 %1395, %v652_v47  }
 0x9a1   :  { %v656_v49 = vpop.permute.xlu0 %655 }
 0x9a2   :  { %v660_v50 = vrot.slane %v656_v49, %v1621_v46 }
 0x9a4   :  { %vm662_vm3 = vcmp.ge.f32.partialorder %v1647_v24, %v660_v50 }
 0x9a5   :  { %v1325_v51 = vsel %vm662_vm3, 1.0, %v1542_v1 }
 0x9a6   :  { %v669_v52 = vrot.slane %v1325_v51, %v1621_v46  ;;  %v673_v53 = vrot.slane %v1325_v51, %v1626_v48 }
 0x9a8   :  { %v676_v54 = vsel %vm178_vm2, %v669_v52, 0.0  ;;  %v677_v55 = vsel %vm178_vm2, %v673_v53, 0.0 }
 0x9a9   :  { %v678_v56 = vadd.f32 %v677_v55, %v676_v54 }
 0x9ab   :  { %679 = vadd.xlane.f32.xlu1 %v678_v56 }
 0xa34   :  { %v680_v57 = vpop.xlane.xlu1 %679 }
 0xa35   :  { %vm681_vm4 = vcmp.ge.f32.partialorder %v680_v57, 50.0 }
 0xa36   :  { %v682_v59 = vsel %vm681_vm4, %v652_v47, %v649_v41  ;;  %v683_v60 = vsel %vm681_vm4, %v650_v42, %v652_v47 }
 0xa37   :  { %v684_v61 = vadd.f32 %v683_v60, %v682_v59 }
 0xa39   :  { %v685_v62 = vmul.f32 0.5, %v684_v61 }
 0xa3b   :  { %688 = vperm.xlu0 %1395, %v685_v62  }
 0xab6   :  { %v689_v63 = vpop.permute.xlu0 %688 }
 0xab7   :  { %v693_v0 = vrot.slane %v689_v63, %v1621_v46 }
 0xab9   :  { %vm695_vm6 = vcmp.ge.f32.partialorder %v1647_v24, %v693_v0 }
 0xaba   :  { %v1326_v2 = vsel %vm695_vm6, 1.0, %v1542_v1 }
 0xabb   :  { %v702_v3 = vrot.slane %v1326_v2, %v1621_v46  ;;  %v706_v5 = vrot.slane %v1326_v2, %v1626_v48 }
 0xabd   :  { %v709_v6 = vsel %vm178_vm2, %v702_v3, 0.0  ;;  %v710_v7 = vsel %vm178_vm2, %v706_v5, 0.0 }
 0xabe   :  { %v711_v8 = vadd.f32 %v710_v7, %v709_v6 }
 0xac0   :  { %712 = vadd.xlane.f32.xlu1 %v711_v8 }
 0xb49   :  { %v713_v9 = vpop.xlane.xlu1 %712 }
 0xb4a   :  { %vm714_vm7 = vcmp.ge.f32.partialorder %v713_v9, 50.0 }
 0xb4b   :  { %v715_v10 = vsel %vm714_vm7, %v685_v62, %v682_v59  ;;  %v716_v11 = vsel %vm714_vm7, %v683_v60, %v685_v62 }
 0xb4c   :  { %v717_v12 = vadd.f32 %v716_v11, %v715_v10 }
 0xb4e   :  { %v718_v13 = vmul.f32 0.5, %v717_v12 }
 0xb50   :  { %721 = vperm.xlu0 %1395, %v718_v13  }
 0xbcb   :  { %v722_v14 = vpop.permute.xlu0 %721 }
 0xbcc   :  { %v726_v15 = vrot.slane %v722_v14, %v1621_v46 }
 0xbce   :  { %vm728_vm8 = vcmp.ge.f32.partialorder %v1647_v24, %v726_v15 }
 0xbcf   :  { %v1327_v16 = vsel %vm728_vm8, 1.0, %v1542_v1 }
 0xbd0   :  { %v735_v17 = vrot.slane %v1327_v16, %v1621_v46  ;;  %v739_v18 = vrot.slane %v1327_v16, %v1626_v48 }
 0xbd2   :  { %v742_v19 = vsel %vm178_vm2, %v735_v17, 0.0  ;;  %v743_v20 = vsel %vm178_vm2, %v739_v18, 0.0 }
 0xbd3   :  { %v744_v21 = vadd.f32 %v743_v20, %v742_v19 }
 0xbd5   :  { %745 = vadd.xlane.f32.xlu1 %v744_v21 }
 0xc5e   :  { %v746_v22 = vpop.xlane.xlu1 %745 }
 0xc5f   :  { %vm747_vm9 = vcmp.ge.f32.partialorder %v746_v22, 50.0 }
 0xc60   :  { %v748_v23 = vsel %vm747_vm9, %v718_v13, %v715_v10  ;;  %v749_v25 = vsel %vm747_vm9, %v716_v11, %v718_v13 }
 0xc61   :  { %v750_v26 = vadd.f32 %v749_v25, %v748_v23 }
 0xc63   :  { %v751_v27 = vmul.f32 0.5, %v750_v26 }
 0xc65   :  { %754 = vperm.xlu0 %1395, %v751_v27  }
 0xce0   :  { %v755_v28 = vpop.permute.xlu0 %754 }
 0xce1   :  { %v759_v29 = vrot.slane %v755_v28, %v1621_v46 }
 0xce3   :  { %vm761_vm10 = vcmp.ge.f32.partialorder %v1647_v24, %v759_v29 }
 0xce4   :  { %v1328_v30 = vsel %vm761_vm10, 1.0, %v1542_v1 }
 0xce5   :  { %v768_v31 = vrot.slane %v1328_v30, %v1621_v46  ;;  %v772_v32 = vrot.slane %v1328_v30, %v1626_v48 }
 0xce7   :  { %v775_v33 = vsel %vm178_vm2, %v768_v31, 0.0  ;;  %v776_v34 = vsel %vm178_vm2, %v772_v32, 0.0 }
 0xce8   :  { %v777_v35 = vadd.f32 %v776_v34, %v775_v33 }
 0xcea   :  { %778 = vadd.xlane.f32.xlu1 %v777_v35 }
 0xd73   :  { %v779_v36 = vpop.xlane.xlu1 %778 }
 0xd74   :  { %vm780_vm11 = vcmp.ge.f32.partialorder %v779_v36, 50.0 }
 0xd75   :  { %v781_v37 = vsel %vm780_vm11, %v751_v27, %v748_v23  ;;  %v782_v38 = vsel %vm780_vm11, %v749_v25, %v751_v27 }
 0xd76   :  { %v783_v39 = vadd.f32 %v782_v38, %v781_v37 }
 0xd78   :  { %v784_v40 = vmul.f32 0.5, %v783_v39 }
 0xd7a   :  { %787 = vperm.xlu0 %1395, %v784_v40  }
 0xdf5   :  { %v788_v41 = vpop.permute.xlu0 %787 }
 0xdf6   :  { %v792_v42 = vrot.slane %v788_v41, %v1621_v46 }
 0xdf8   :  { %vm794_vm12 = vcmp.ge.f32.partialorder %v1647_v24, %v792_v42 }
 0xdf9   :  { %v1329_v45 = vsel %vm794_vm12, 1.0, %v1542_v1 }
 0xdfa   :  { %v801_v47 = vrot.slane %v1329_v45, %v1621_v46  ;;  %v805_v49 = vrot.slane %v1329_v45, %v1626_v48 }
 0xdfc   :  { %v808_v50 = vsel %vm178_vm2, %v801_v47, 0.0  ;;  %v809_v51 = vsel %vm178_vm2, %v805_v49, 0.0 }
 0xdfd   :  { %v810_v52 = vadd.f32 %v809_v51, %v808_v50 }
 0xdff   :  { %811 = vadd.xlane.f32.xlu1 %v810_v52 }
 0xe88   :  { %v812_v53 = vpop.xlane.xlu1 %811 }
 0xe89   :  { %vm813_vm13 = vcmp.ge.f32.partialorder %v812_v53, 50.0 }
 0xe8a   :  { %v814_v54 = vsel %vm813_vm13, %v784_v40, %v781_v37  ;;  %v815_v55 = vsel %vm813_vm13, %v782_v38, %v784_v40 }
 0xe8b   :  { %v816_v56 = vadd.f32 %v815_v55, %v814_v54 }
 0xe8d   :  { %v817_v57 = vmul.f32 0.5, %v816_v56 }
 0xe8f   :  { %820 = vperm.xlu0 %1395, %v817_v57  }
 0xf0a   :  { %v821_v59 = vpop.permute.xlu0 %820 }
 0xf0b   :  { %v825_v60 = vrot.slane %v821_v59, %v1621_v46 }
 0xf0d   :  { %vm827_vm14 = vcmp.ge.f32.partialorder %v1647_v24, %v825_v60 }
 0xf0e   :  { %v1330_v61 = vsel %vm827_vm14, 1.0, %v1542_v1 }
 0xf0f   :  { %v834_v62 = vrot.slane %v1330_v61, %v1621_v46  ;;  %v838_v63 = vrot.slane %v1330_v61, %v1626_v48 }
 0xf11   :  { %v841_v0 = vsel %vm178_vm2, %v834_v62, 0.0  ;;  %v842_v2 = vsel %vm178_vm2, %v838_v63, 0.0 }
 0xf12   :  { %v843_v3 = vadd.f32 %v842_v2, %v841_v0 }
 0xf14   :  { %844 = vadd.xlane.f32.xlu1 %v843_v3 }
 0xf9d   :  { %v845_v5 = vpop.xlane.xlu1 %844 }
 0xf9e   :  { %vm846_vm15 = vcmp.ge.f32.partialorder %v845_v5, 50.0 }
 0xf9f   :  { %v847_v6 = vsel %vm846_vm15, %v817_v57, %v814_v54  ;;  %v848_v7 = vsel %vm846_vm15, %v815_v55, %v817_v57 }
 0xfa0   :  { %v849_v8 = vadd.f32 %v848_v7, %v847_v6 }
 0xfa2   :  { %v850_v9 = vmul.f32 0.5, %v849_v8 }
 0xfa4   :  { %853 = vperm.xlu0 %1395, %v850_v9  }
0x101f   :  { %v854_v10 = vpop.permute.xlu0 %853 }
0x1020   :  { %v858_v11 = vrot.slane %v854_v10, %v1621_v46 }
0x1022   :  { %vm860_vm0 = vcmp.ge.f32.partialorder %v1647_v24, %v858_v11 }
0x1023   :  { %v1331_v12 = vsel %vm860_vm0, 1.0, %v1542_v1 }
0x1024   :  { %v867_v13 = vrot.slane %v1331_v12, %v1621_v46  ;;  %v871_v14 = vrot.slane %v1331_v12, %v1626_v48 }
0x1026   :  { %v874_v15 = vsel %vm178_vm2, %v867_v13, 0.0  ;;  %v875_v16 = vsel %vm178_vm2, %v871_v14, 0.0 }
0x1027   :  { %v876_v17 = vadd.f32 %v875_v16, %v874_v15 }
0x1029   :  { %877 = vadd.xlane.f32.xlu1 %v876_v17 }
0x10b2   :  { %v878_v18 = vpop.xlane.xlu1 %877 }
0x10b3   :  { %vm879_vm1 = vcmp.ge.f32.partialorder %v878_v18, 50.0 }
0x10b4   :  { %v880_v19 = vsel %vm879_vm1, %v850_v9, %v847_v6  ;;  %v881_v20 = vsel %vm879_vm1, %v848_v7, %v850_v9 }
0x10b5   :  { %v882_v21 = vadd.f32 %v881_v20, %v880_v19 }
0x10b7   :  { %v883_v22 = vmul.f32 0.5, %v882_v21 }
0x10b9   :  { %886 = vperm.xlu0 %1395, %v883_v22  }
0x1134   :  { %v887_v23 = vpop.permute.xlu0 %886 }
0x1135   :  { %v891_v25 = vrot.slane %v887_v23, %v1621_v46 }
0x1137   :  { %vm893_vm3 = vcmp.ge.f32.partialorder %v1647_v24, %v891_v25 }
0x1138   :  { %v1332_v26 = vsel %vm893_vm3, 1.0, %v1542_v1 }
0x1139   :  { %v900_v27 = vrot.slane %v1332_v26, %v1621_v46  ;;  %v904_v28 = vrot.slane %v1332_v26, %v1626_v48 }
0x113b   :  { %v907_v29 = vsel %vm178_vm2, %v900_v27, 0.0  ;;  %v908_v30 = vsel %vm178_vm2, %v904_v28, 0.0 }
0x113c   :  { %v909_v31 = vadd.f32 %v908_v30, %v907_v29 }
0x113e   :  { %910 = vadd.xlane.f32.xlu1 %v909_v31 }
0x11c7   :  { %v911_v32 = vpop.xlane.xlu1 %910 }
0x11c8   :  { %vm912_vm4 = vcmp.ge.f32.partialorder %v911_v32, 50.0 }
0x11c9   :  { %v913_v33 = vsel %vm912_vm4, %v883_v22, %v880_v19  ;;  %v914_v34 = vsel %vm912_vm4, %v881_v20, %v883_v22 }
0x11ca   :  { %v915_v35 = vadd.f32 %v914_v34, %v913_v33 }
0x11cc   :  { %v916_v36 = vmul.f32 0.5, %v915_v35 }
0x11ce   :  { %919 = vperm.xlu0 %1395, %v916_v36  }
0x1249   :  { %v920_v37 = vpop.permute.xlu0 %919 }
0x124a   :  { %v924_v38 = vrot.slane %v920_v37, %v1621_v46 }
0x124c   :  { %vm926_vm6 = vcmp.ge.f32.partialorder %v1647_v24, %v924_v38 }
0x124d   :  { %v1333_v39 = vsel %vm926_vm6, 1.0, %v1542_v1 }
0x124e   :  { %v933_v40 = vrot.slane %v1333_v39, %v1621_v46  ;;  %v937_v41 = vrot.slane %v1333_v39, %v1626_v48 }
0x1250   :  { %v940_v42 = vsel %vm178_vm2, %v933_v40, 0.0  ;;  %v941_v45 = vsel %vm178_vm2, %v937_v41, 0.0 }
0x1251   :  { %v942_v47 = vadd.f32 %v941_v45, %v940_v42 }
0x1253   :  { %943 = vadd.xlane.f32.xlu1 %v942_v47 }
0x12dc   :  { %v944_v49 = vpop.xlane.xlu1 %943 }
0x12dd   :  { %vm945_vm7 = vcmp.ge.f32.partialorder %v944_v49, 50.0 }
0x12de   :  { %v946_v50 = vsel %vm945_vm7, %v916_v36, %v913_v33  ;;  %v947_v51 = vsel %vm945_vm7, %v914_v34, %v916_v36 }
0x12df   :  { %v948_v52 = vadd.f32 %v947_v51, %v946_v50 }
0x12e1   :  { %v949_v53 = vmul.f32 0.5, %v948_v52 }
0x12e3   :  { %952 = vperm.xlu0 %1395, %v949_v53  }
0x135e   :  { %v953_v54 = vpop.permute.xlu0 %952 }
0x135f   :  { %v957_v55 = vrot.slane %v953_v54, %v1621_v46 }
0x1361   :  { %vm959_vm8 = vcmp.ge.f32.partialorder %v1647_v24, %v957_v55 }
0x1362   :  { %v1334_v56 = vsel %vm959_vm8, 1.0, %v1542_v1 }
0x1363   :  { %v966_v57 = vrot.slane %v1334_v56, %v1621_v46  ;;  %v970_v59 = vrot.slane %v1334_v56, %v1626_v48 }
0x1365   :  { %v973_v60 = vsel %vm178_vm2, %v966_v57, 0.0  ;;  %v974_v61 = vsel %vm178_vm2, %v970_v59, 0.0 }
0x1366   :  { %v975_v62 = vadd.f32 %v974_v61, %v973_v60 }
0x1368   :  { %976 = vadd.xlane.f32.xlu1 %v975_v62 }
0x13f1   :  { %v977_v63 = vpop.xlane.xlu1 %976 }
0x13f2   :  { %vm978_vm9 = vcmp.ge.f32.partialorder %v977_v63, 50.0 }
0x13f3   :  { %v979_v0 = vsel %vm978_vm9, %v949_v53, %v946_v50  ;;  %v980_v2 = vsel %vm978_vm9, %v947_v51, %v949_v53 }
0x13f4   :  { %v981_v3 = vadd.f32 %v980_v2, %v979_v0 }
0x13f6   :  { %v982_v5 = vmul.f32 0.5, %v981_v3 }
0x13f8   :  { %985 = vperm.xlu0 %1395, %v982_v5  }
0x1473   :  { %v986_v6 = vpop.permute.xlu0 %985 }
0x1474   :  { %v990_v7 = vrot.slane %v986_v6, %v1621_v46 }
0x1476   :  { %vm992_vm10 = vcmp.ge.f32.partialorder %v1647_v24, %v990_v7 }
0x1477   :  { %v1335_v8 = vsel %vm992_vm10, 1.0, %v1542_v1 }
0x1478   :  { %v999_v9 = vrot.slane %v1335_v8, %v1621_v46  ;;  %v1003_v10 = vrot.slane %v1335_v8, %v1626_v48 }
0x147a   :  { %v1006_v11 = vsel %vm178_vm2, %v999_v9, 0.0  ;;  %v1007_v12 = vsel %vm178_vm2, %v1003_v10, 0.0 }
0x147b   :  { %v1008_v13 = vadd.f32 %v1007_v12, %v1006_v11 }
0x147d   :  { %1009 = vadd.xlane.f32.xlu1 %v1008_v13 }
0x1506   :  { %v1010_v14 = vpop.xlane.xlu1 %1009 }
0x1507   :  { %vm1011_vm11 = vcmp.ge.f32.partialorder %v1010_v14, 50.0 }
0x1508   :  { %v1012_v15 = vsel %vm1011_vm11, %v982_v5, %v979_v0  ;;  %v1013_v16 = vsel %vm1011_vm11, %v980_v2, %v982_v5 }
0x1509   :  { %v1014_v17 = vadd.f32 %v1013_v16, %v1012_v15 }
0x150b   :  { %v1015_v18 = vmul.f32 0.5, %v1014_v17 }
0x150d   :  { %1018 = vperm.xlu0 %1395, %v1015_v18  }
0x1588   :  { %v1019_v19 = vpop.permute.xlu0 %1018 }
0x1589   :  { %v1023_v20 = vrot.slane %v1019_v19, %v1621_v46 }
0x158b   :  { %vm1025_vm12 = vcmp.ge.f32.partialorder %v1647_v24, %v1023_v20 }
0x158c   :  { %v1336_v21 = vsel %vm1025_vm12, 1.0, %v1542_v1 }
0x158d   :  { %v1032_v22 = vrot.slane %v1336_v21, %v1621_v46  ;;  %v1036_v23 = vrot.slane %v1336_v21, %v1626_v48 }
0x158f   :  { %v1039_v25 = vsel %vm178_vm2, %v1032_v22, 0.0  ;;  %v1040_v26 = vsel %vm178_vm2, %v1036_v23, 0.0 }
0x1590   :  { %v1041_v27 = vadd.f32 %v1040_v26, %v1039_v25 }
0x1592   :  { %1042 = vadd.xlane.f32.xlu1 %v1041_v27 }
0x161b   :  { %v1043_v28 = vpop.xlane.xlu1 %1042 }
0x161c   :  { %vm1044_vm13 = vcmp.ge.f32.partialorder %v1043_v28, 50.0 }
0x161d   :  { %v1045_v29 = vsel %vm1044_vm13, %v1015_v18, %v1012_v15  ;;  %v1046_v30 = vsel %vm1044_vm13, %v1013_v16, %v1015_v18 }
0x161e   :  { %v1047_v31 = vadd.f32 %v1046_v30, %v1045_v29 }
0x1620   :  { %v1048_v32 = vmul.f32 0.5, %v1047_v31 }
0x1622   :  { %1051 = vperm.xlu0 %1395, %v1048_v32  }
0x169d   :  { %v1052_v33 = vpop.permute.xlu0 %1051 }
0x169e   :  { %v1056_v34 = vrot.slane %v1052_v33, %v1621_v46 }
0x16a0   :  { %vm1058_vm14 = vcmp.ge.f32.partialorder %v1647_v24, %v1056_v34 }
0x16a1   :  { %v1337_v35 = vsel %vm1058_vm14, 1.0, %v1542_v1 }
0x16a2   :  { %v1065_v36 = vrot.slane %v1337_v35, %v1621_v46  ;;  %v1069_v37 = vrot.slane %v1337_v35, %v1626_v48 }
0x16a4   :  { %v1072_v38 = vsel %vm178_vm2, %v1065_v36, 0.0  ;;  %v1073_v39 = vsel %vm178_vm2, %v1069_v37, 0.0 }
0x16a5   :  { %v1074_v40 = vadd.f32 %v1073_v39, %v1072_v38 }
0x16a7   :  { %1075 = vadd.xlane.f32.xlu1 %v1074_v40 }
0x1730   :  { %v1076_v41 = vpop.xlane.xlu1 %1075 }
0x1731   :  { %vm1077_vm15 = vcmp.ge.f32.partialorder %v1076_v41, 50.0 }
0x1732   :  { %v1078_v42 = vsel %vm1077_vm15, %v1048_v32, %v1045_v29  ;;  %v1079_v45 = vsel %vm1077_vm15, %v1046_v30, %v1048_v32 }
0x1733   :  { %v1080_v47 = vadd.f32 %v1079_v45, %v1078_v42 }
0x1735   :  { %v1081_v49 = vmul.f32 0.5, %v1080_v47 }
0x1737   :  { %1084 = vperm.xlu0 %1395, %v1081_v49  }
0x17b2   :  { %v1085_v50 = vpop.permute.xlu0 %1084 }
0x17b3   :  { %v1089_v51 = vrot.slane %v1085_v50, %v1621_v46 }
0x17b5   :  { %vm1091_vm0 = vcmp.ge.f32.partialorder %v1647_v24, %v1089_v51 }
0x17b6   :  { %v1338_v52 = vsel %vm1091_vm0, 1.0, %v1542_v1 }
0x17b7   :  { %v1098_v53 = vrot.slane %v1338_v52, %v1621_v46  ;;  %v1102_v54 = vrot.slane %v1338_v52, %v1626_v48 }
0x17b9   :  { %v1105_v55 = vsel %vm178_vm2, %v1098_v53, 0.0  ;;  %v1106_v56 = vsel %vm178_vm2, %v1102_v54, 0.0 }
0x17ba   :  { %v1107_v57 = vadd.f32 %v1106_v56, %v1105_v55 }
0x17bc   :  { %1108 = vadd.xlane.f32.xlu1 %v1107_v57 }
0x1845   :  { %v1109_v59 = vpop.xlane.xlu1 %1108 }
0x1846   :  { %vm1110_vm1 = vcmp.ge.f32.partialorder %v1109_v59, 50.0 }
0x1847   :  { %v1111_v60 = vsel %vm1110_vm1, %v1081_v49, %v1078_v42 }
0x1848   :  { %1114 = vperm.xlu0 %1395, %v1111_v60  }
0x18c3   :  { %v1115_v61 = vpop.permute.xlu0 %1114 }
0x18c4   :  { %v1119_v62 = vrot.slane %v1115_v61, %v1621_v46 }
0x18c6   :  { %vm1121_vm3 = vcmp.ge.f32.partialorder %v1647_v24, %v1119_v62 }
0x18c7   :  { %v1122_v1 = vsel %vm1121_vm3, %v1647_v24, -1e+30 }
0x18c8   :  { %v1127_v63 = vrot.slane %v1122_v1, %v1621_v46  ;;  %v1131_v0 = vrot.slane %v1122_v1, %v1626_v48 }
0x18ca   :  { %v1134_v2 = vsel %vm178_vm2, %v1127_v63, -inf  ;;  %v1135_v3 = vsel %vm178_vm2, %v1131_v0, -inf }
0x18cb   :  { %v1136_v5 = vmax.f32 %v1134_v2, %v1135_v3 }
0x18cd   :  { %1137 = vmax.xlane.f32.xlu1 %v1136_v5 }
0x1956   :  { %v1138_v6 = vpop.xlane.xlu1 %1137 }
0x1957   :  { %v1143_v7 = vrot.slane %v1138_v6, %v1621_v46 }
0x1959   :  { %v1145_v8 = vsub.f32 %v1122_v1, %v1143_v7 }
0x195b   :  { %v1146_v9 = vmul.f32 1.442695, %v1145_v8 }
0x195d   :  { %1420 = vpow2.f32 %v1146_v9 }
0x196a   :  { %v1421_v10 = vpop.eup %1420 }
0x196b   :  { %v1152_v11 = vrot.slane %v1421_v10, %v1621_v46  ;;  %v1156_v24 = vrot.slane %v1421_v10, %v1626_v48 }
0x196d   :  { %v1159_v12 = vsel %vm178_vm2, %v1152_v11, 0.0  ;;  %v1160_v13 = vsel %vm178_vm2, %v1156_v24, 0.0 }
0x196e   :  { %v1161_v14 = vadd.f32 %v1160_v13, %v1159_v12 }
0x1970   :  { %1162 = vadd.xlane.f32.xlu0 %v1161_v14 }
0x19f9   :  { %v1163_v15 = vpop.xlane.xlu0 %1162 }
0x19fa   :  { %1422 = vrcp.f32 %v1163_v15 }
0x1a07   :  { %v1423_v16 = vpop.eup %1422 }
0x1a08   :  { %v1165_v17 = vmul.f32 %v1423_v16, %v1163_v15 }
0x1a0a   :  { %v1166_v18 = vsub.f32 2.0, %v1165_v17 }
0x1a0c   :  { %v1167_v19 = vmul.f32 %v1423_v16, %v1166_v18 }
0x1a0e   :  { %v1172_v20 = vrot.slane %v1167_v19, %v1621_v46 }
0x1a10   :  { %v1174_v21 = vmul.f32 %v1421_v10, %v1172_v20 }
0x1a12   :  { %1175 = vst.msk [vmem:[#allocation14] sm:$0x3] %vm1636_vm5, %v1174_v21 }
0x1a13   :  { %1528 = dma.done.wait [#allocation6], 32 }
0x1a14   :  { %1529 = vsyncadd [#allocation6], 4294967264  ;;  %v1179_v22 = vld [vmem:[#allocation5] sm:$0x3]  ;;  %v1204_v30 = vcombine.low %v1616_v43, %v1619_v44  ;;  %s1547_s4 = smov [#allocation14]  }
0x1a15   :  { %v1180_v23 = vadd.f32 %v1179_v22, %v1122_v1  ;;  %s1263_s22 = sshll.u32 %s1547_s4, 4  ;;  %s1264_s22 = int_to_ptr.vmem [resolvable:$true] %s1263_s22 }
0x1a16   :  { %v1211_v4 = vrot.slane %v1204_v30, %v1630_v58  ;;  %s1484_s23 = scalar_lea.vmem %s1264_s22, 32  ;;  %p1489_p2 = scmp.lt.s32.totalorder %s1264_s22, %s1264_s22 }
0x1a17   :  { %v1185_v25 = vrot.slane %v1180_v23, %v1621_v46  ;;  %v1189_v26 = vrot.slane %v1180_v23, %v1626_v48  ;;  %p1485_p1 = scmp.ne.s32.totalorder %s1264_s22, %s1484_s23  ;;  %p1490_p3 = scmp.lt.s32.totalorder %s1484_s23, %s1484_s23 }
0x1a18   :  { %v1218_v31 = vrot.slane %v1211_v4, %v1630_v58 }
0x1a19   :  { %v1192_v27 = vsel %vm178_vm2, %v1185_v25, -inf  ;;  %v1193_v28 = vsel %vm178_vm2, %v1189_v26, -inf  ;;  %p1491_p4 = por %p1490_p3, %p1489_p2 }
0x1a1a   :  { %v1194_v29 = vmax.f32 %v1192_v27, %v1193_v28 }
0x1a1b   :  { %p1492_p5 = pnand %p1491_p4, %p1485_p1 }
0x1a1c   :  { %1195 = vmax.xlane.f32.xlu0 %v1194_v29 }
0x1aa5   :  { %v1196_v32 = vpop.xlane.xlu0 %1195 }
0x1aa6   :  { %v1201_v33 = vrot.slane %v1196_v32, %v1621_v46 }
0x1aa8   :  { %vm1203_vm5 = vcmp.ge.f32.partialorder %v1180_v23, %v1201_v33 }
0x1aa9   :  { %v1219_v34 = vsel %vm1203_vm5, %v1218_v31, 256 }
0x1aaa   :  { %v1223_v35 = vrot.slane %v1219_v34, %v1621_v46  ;;  %v1227_v36 = vrot.slane %v1219_v34, %v1626_v48 }
0x1aac   :  { %v1228_v37 = vsel %vm178_vm2, %v1223_v35, 2147483647  ;;  %v1229_v38 = vsel %vm178_vm2, %v1227_v36, 2147483647 }
0x1aad   :  { %vm1230_vm4 = vcmp.lt.s32.totalorder %v1228_v37, %v1229_v38 }
0x1aae   :  { %v1231_v39 = vsel %vm1230_vm4, %v1228_v37, %v1229_v38 }
0x1aaf   :  { %v1233_v43 = vshra.s32 %v1231_v39, 16  ;;  %v1232_v40 = vand.u32 65535, %v1231_v39 }
0x1ab1   :  { %v1235_v44 = vcvt.s32.f32 %v1233_v43  ;;  %v1234_v41 = vcvt.s32.f32 %v1232_v40 }
0x1ab3   :  { %1236 = vmin.xlane.f32.xlu0 %v1235_v44 }
0x1b3c   :  { %v1237_v58 = vpop.xlane.xlu0 %1236 }
0x1b3d   :  { %vm1238_vm6 = vcmp.eq.f32.partialorder %v1235_v44, %v1237_v58 }
0x1b3e   :  { %v1239_v42 = vsel %vm1238_vm6, %v1234_v41, inf }
0x1b3f   :  { %1240 = vmin.xlane.f32.xlu1 %v1239_v42 }
0x1b40   :  { %1495 = shalt.err (!%p1492_p5)
}
0x1b41   :  { %1266 = dma.vmem_to_hbm [thread:$0]  %s1264_s22, 32, %s1829_s7, [#allocation15]   ;;  %v1243_v46 = vcvt.f32.s32 %v1237_v58 }
0x1b42   :  { %s1548_s26 = smov [#allocation13]  }
0x1b43   :  { %s1253_s27 = sshll.u32 %s1548_s26, 4  ;;  %v1244_v45 = vshll.u32 %v1243_v46, 16  ;;  %s1254_s27 = int_to_ptr.vmem [resolvable:$true] %s1253_s27 }
0x1b44   :  { %s1504_s28 = scalar_lea.vmem %s1254_s27, 16  ;;  %s1508_s29 = scalar_lea.vmem %s1254_s27, 32 }
0x1b45   :  { %p1505_p6 = scmp.ne.s32.totalorder %s1254_s27, %s1504_s28  ;;  %p1509_p7 = scmp.lt.s32.totalorder %s1254_s27, %s1254_s27 }
0x1b46   :  { %p1510_p8 = scmp.lt.s32.totalorder %s1508_s29, %s1504_s28 }
0x1b48   :  { %p1511_p9 = por %p1510_p8, %p1509_p7 }
0x1b4a   :  { %p1512_p10 = pnand %p1511_p9, %p1505_p6 }
0x1bc8   :  { %v1241_v48 = vpop.xlane.xlu1 %1240 }
0x1bc9   :  { %v1242_v47 = vcvt.f32.s32 %v1241_v48 }
0x1bcb   :  { %v1245_v49 = vadd.s32 %v1244_v45, %v1242_v47 }
0x1bcd   :  { %1246 = vst [vmem:[#allocation13] sm:$0x1] %v1245_v49 }
0x1bce   :  { %1515 = shalt.err (!%p1512_p10)
}
0x1bcf   :  { %1256 = dma.vmem_to_hbm [thread:$0]  %s1254_s27, 16, %s1828_s6, [#allocation9]  }
0x1bd0   :  { %1530 = dma.done.wait [#allocation9], 16  }
0x1bd1   :  { %1531 = vsyncadd [#allocation9], 4294967280 }
0x1bd2   :  { %1532 = dma.done.wait [#allocation15], 32  }
0x1bd3   :  { %1533 = vsyncadd [#allocation15], 4294967264 }
0x1bd4   :  { %1273 = vsyncpa [#allocation8], 1 }
0x1bd5   :  { %1274 = vsyncpa [#allocation11], 1 }
0x1bd6   :  { %1275 = vsyncpa [#allocation9], 1 }
0x1bd7   :  { %1276 = vsyncpa [#allocation15], 1 }
0x1bd8   :  { %1277 = vsyncmov [#allocation6] }
0x1bdb   :  { %s1278_s7 = vpop.sfrf %1277 }
0x1bdc   :  { %p1339_p11 = scmp.ne.s32.totalorder %s1278_s7, 0 }
0x1bde   :  { %1282 = shalt.err (%p1339_p11)  }

</bundles_post_ra>
